<compile_context>
chip_gen: v7x
topology: tpu7x:2x2x1
jax: 0.10.0
libtpu: 0.0.40
codegen_flags: <defaults>
</compile_context>

<pallas_src>
import jax
import jax.numpy as jnp
from jax.experimental import pallas as pl
from jax.experimental.pallas import tpu as pltpu

_LANE = 128
_K_TILE = 512


def _head_kernel(x_ref, w1_ref, b1_ref, w2_ref, b2_ref, o_ref, acc_ref):
    # x_ref : (B, Kt, HW)   f32   channel tile of the feature map
    # w1_ref: (Kt, 512)     bf16  matching K-tile of the first Linear
    # b1_ref: (1, 512)      f32
    # w2_ref: (512, Npad)   bf16
    # b2_ref: (1, Npad)     f32
    # o_ref : (B, Npad)     f32
    # acc_ref: (B, 512)     f32   running partial of feat @ w1
    k = pl.program_id(0)

    @pl.when(k == 0)
    def _init():
        acc_ref[...] = jnp.zeros_like(acc_ref)

    # AdaptiveAvgPool2d((1,1)) + Flatten for this channel tile: mean over the
    # spatial (last) axis, accumulated in f32.
    feat = jnp.mean(x_ref[...].astype(jnp.float32), axis=-1)        # (B, Kt)

    # Partial Linear(2048, 512): bf16 operands, f32 accumulation.
    acc_ref[...] += jnp.dot(feat.astype(jnp.bfloat16), w1_ref[...],
                            preferred_element_type=jnp.float32)

    @pl.when(k == pl.num_programs(0) - 1)
    def _finalize():
        # bias + ReLU; Dropout(0.3) is identity in eval/inference mode.
        h = jnp.maximum(acc_ref[...] + b1_ref[...], 0.0)             # (B, 512)
        logits = jnp.dot(h.astype(jnp.bfloat16), w2_ref[...],
                         preferred_element_type=jnp.float32) + b2_ref[...]
        o_ref[...] = logits.astype(o_ref.dtype)                      # (B, Npad)


def skin_classifier_head(x_nchw, w1, b1, w2, b2):
    """x_nchw: (B, C=2048, H, W) feature map from the backbone.

    w1: (2048, 512), b1: (512,), w2: (512, num_classes), b2: (num_classes,).
    Weights may be pre-cast to bf16 (recommended); casts below are no-ops then.
    """
    B, C, H, W = x_nchw.shape
    hidden = w1.shape[1]
    num_classes = w2.shape[1]
    HW = H * W

    # Free reshape (contiguous NCHW -> (B, C, HW)); no transpose, no extra HBM
    # pass over x.  Channel tile lands on the sublane axis, spatial on lanes.
    x = x_nchw.reshape(B, C, HW)

    # Weights in bf16 (dominant byte stream); biases stay f32.
    w1 = w1.astype(jnp.bfloat16)
    w2 = w2.astype(jnp.bfloat16)

    # Pad the class dim up to a lane-dense multiple of 128 for an unmasked
    # output store; sliced back off after the kernel.
    n_pad = ((num_classes + _LANE - 1) // _LANE) * _LANE
    w2p = jnp.pad(w2, ((0, 0), (0, n_pad - num_classes)))
    b2p = jnp.pad(b2.astype(jnp.float32), (0, n_pad - num_classes)).reshape(1, n_pad)
    b1p = b1.astype(jnp.float32).reshape(1, hidden)

    k_tile = min(_K_TILE, C)
    assert C % k_tile == 0, "channel count must be divisible by the K tile"
    n_k = C // k_tile

    out = pl.pallas_call(
        _head_kernel,
        out_shape=jax.ShapeDtypeStruct((B, n_pad), jnp.float32),
        grid_spec=pltpu.PrefetchScalarGridSpec(
            num_scalar_prefetch=0,
            grid=(n_k,),
            in_specs=[
                pl.BlockSpec((B, k_tile, HW), lambda k: (0, k, 0)),   # x tile
                pl.BlockSpec((k_tile, hidden), lambda k: (k, 0)),     # w1 tile
                pl.BlockSpec((1, hidden), lambda k: (0, 0)),          # b1
                pl.BlockSpec((hidden, n_pad), lambda k: (0, 0)),      # w2
                pl.BlockSpec((1, n_pad), lambda k: (0, 0)),           # b2
            ],
            out_specs=pl.BlockSpec((B, n_pad), lambda k: (0, 0)),
            scratch_shapes=[pltpu.VMEM((B, hidden), jnp.float32)],
        ),
        compiler_params=pltpu.CompilerParams(
            dimension_semantics=("arbitrary",),   # K is a reduction axis
        ),
    )(x, w1, b1p, w2p, b2p)

    return out[:, :num_classes]


def _reference(x_nchw, w1, b1, w2, b2):
    feat = jnp.mean(x_nchw, axis=(2, 3))                  # (B, 2048)
    h = jnp.maximum(feat @ w1 + b1, 0.0)                  # (B, 512)
    return h @ w2 + b2                                    # (B, num_classes)


if __name__ == "__main__":
    key = jax.random.PRNGKey(0)
    B, C, H, W = 2, 2048, 4, 4       # small spatial feature map from backbone
    hidden = 512
    num_classes = 7                  # e.g. HAM10000 skin-lesion classes

    kx, k1, kb1, k2, kb2 = jax.random.split(key, 5)
    x = jax.random.normal(kx, (B, C, H, W), dtype=jnp.float32)
    w1 = jax.random.normal(k1, (C, hidden), dtype=jnp.float32) * 0.02
    b1 = jax.random.normal(kb1, (hidden,), dtype=jnp.float32) * 0.01
    w2 = jax.random.normal(k2, (hidden, num_classes), dtype=jnp.float32) * 0.02
    b2 = jax.random.normal(kb2, (num_classes,), dtype=jnp.float32) * 0.01

    # Prepare weights once (serving-style): store the big matrices in bf16 so
    # the per-call kernel only streams half the bytes.
    w1_bf = w1.astype(jnp.bfloat16)
    w2_bf = w2.astype(jnp.bfloat16)

    head = jax.jit(skin_classifier_head)
    out = head(x, w1_bf, b1, w2_bf, b2)
    out = jax.block_until_ready(out)

    ref = _reference(x, w1, b1, w2, b2)   # f32 reference
    assert out.shape == (B, num_classes)
    assert jnp.allclose(out, ref, atol=2e-2, rtol=2e-2), "mismatch vs reference"
    print("KERNEL_OK")
</pallas_src>

<mosaic_0001>
module attributes {stable_mosaic.version = 11 : i64} {
  func.func @_head_kernel(%arg0: i32, %arg1: memref<2x512x16xf32, #tpu.memory_space<vmem>>, %arg2: memref<512x512xbf16, #tpu.memory_space<vmem>>, %arg3: memref<1x512xf32, #tpu.memory_space<vmem>>, %arg4: memref<512x128xbf16, #tpu.memory_space<vmem>>, %arg5: memref<1x128xf32, #tpu.memory_space<vmem>>, %arg6: memref<2x128xf32, #tpu.memory_space<vmem>>, %arg7: memref<2x512xf32, #tpu.memory_space<vmem>>) attributes {dimension_semantics = [#tpu.dimension_semantics<arbitrary>], iteration_bounds = array<i64: 4>, scalar_prefetch = 0 : i64, scratch_operands = 1 : i64, tpu.core_type = #tpu.core_type<tc>, window_params = [{transform_indices = @transform_0, window_bounds = array<i64: 2, 512, 16>}, {transform_indices = @transform_1, window_bounds = array<i64: 512, 512>}, {pipeline_mode = #tpu.pipeline_mode<synchronous>, transform_indices = @transform_2, window_bounds = array<i64: 1, 512>}, {pipeline_mode = #tpu.pipeline_mode<synchronous>, transform_indices = @transform_3, window_bounds = array<i64: 512, 128>}, {pipeline_mode = #tpu.pipeline_mode<synchronous>, transform_indices = @transform_4, window_bounds = array<i64: 1, 128>}, {pipeline_mode = #tpu.pipeline_mode<synchronous>, transform_indices = @transform_5, window_bounds = array<i64: 2, 128>}]} {
    %c0_i32 = arith.constant 0 : i32
    %0 = arith.cmpi eq, %arg0, %c0_i32 : i32
    %1 = arith.extui %0 : i1 to i32
    %c0_i32_0 = arith.constant 0 : i32
    %2 = arith.cmpi ne, %1, %c0_i32_0 : i32
    scf.if %2 {
      %cst_12 = arith.constant 0.000000e+00 : f32
      %16 = vector.broadcast %cst_12 : f32 to vector<2x512xf32>
      %c0_13 = arith.constant 0 : index
      %c0_14 = arith.constant 0 : index
      %17 = vector.load %arg7[%c0_13, %c0_14] : memref<2x512xf32, #tpu.memory_space<vmem>>, vector<2x512xf32>
      tpu.vector_store %arg7[%c0_13, %c0_14], %16 {strides = array<i32>} : memref<2x512xf32, #tpu.memory_space<vmem>>, vector<2x512xf32>,
    } else {
    }
    %c0 = arith.constant 0 : index
    %c0_1 = arith.constant 0 : index
    %c0_2 = arith.constant 0 : index
    %3 = vector.load %arg1[%c0, %c0_1, %c0_2] : memref<2x512x16xf32, #tpu.memory_space<vmem>>, vector<2x512x16xf32>
    %cst = arith.constant dense<0.000000e+00> : vector<2x512xf32>
    %4 = vector.multi_reduction <add>, %3, %cst [2] : vector<2x512x16xf32> to vector<2x512xf32>
    %cst_3 = arith.constant 1.600000e+01 : f32
    %5 = vector.broadcast %cst_3 : f32 to vector<2x512xf32>
    %6 = arith.divf %4, %5 : vector<2x512xf32>
    %c0_4 = arith.constant 0 : index
    %c0_5 = arith.constant 0 : index
    %7 = vector.load %arg7[%c0_4, %c0_5] : memref<2x512xf32, #tpu.memory_space<vmem>>, vector<2x512xf32>
    %8 = arith.truncf %6 : vector<2x512xf32> to vector<2x512xbf16>
    %c0_6 = arith.constant 0 : index
    %c0_7 = arith.constant 0 : index
    %9 = vector.load %arg2[%c0_6, %c0_7] : memref<512x512xbf16, #tpu.memory_space<vmem>>, vector<512x512xbf16>
    %cst_8 = arith.constant dense<0.000000e+00> : vector<2x512xf32>
    %10 = tpu.matmul %8, %9, %cst_8 {dimension_numbers = #tpu.dot_dimension_numbers<[1], [0], [0], [1], [0, 0, 1, 1], [], []>} : vector<2x512xbf16>, vector<512x512xbf16>, vector<2x512xf32> -> vector<2x512xf32>
    %11 = arith.addf %7, %10 : vector<2x512xf32>
    %c0_9 = arith.constant 0 : index
    %c0_10 = arith.constant 0 : index
    %12 = vector.load %arg7[%c0_9, %c0_10] : memref<2x512xf32, #tpu.memory_space<vmem>>, vector<2x512xf32>
    tpu.vector_store %arg7[%c0_9, %c0_10], %11 {strides = array<i32>} : memref<2x512xf32, #tpu.memory_space<vmem>>, vector<2x512xf32>,
    %c3_i32 = arith.constant 3 : i32
    %13 = arith.cmpi eq, %arg0, %c3_i32 : i32
    %14 = arith.extui %13 : i1 to i32
    %c0_i32_11 = arith.constant 0 : i32
    %15 = arith.cmpi ne, %14, %c0_i32_11 : i32
    scf.if %15 {
      %c0_12 = arith.constant 0 : index
      %c0_13 = arith.constant 0 : index
      %16 = vector.load %arg7[%c0_12, %c0_13] : memref<2x512xf32, #tpu.memory_space<vmem>>, vector<2x512xf32>
      %c0_14 = arith.constant 0 : index
      %c0_15 = arith.constant 0 : index
      %17 = vector.load %arg3[%c0_14, %c0_15] : memref<1x512xf32, #tpu.memory_space<vmem>>, vector<1x512xf32>
      %18 = vector.broadcast %17 : vector<1x512xf32> to vector<2x512xf32>
      %19 = arith.addf %16, %18 : vector<2x512xf32>
      %cst_16 = arith.constant 0.000000e+00 : f32
      %20 = vector.broadcast %cst_16 : f32 to vector<2x512xf32>
      %21 = arith.maximumf %19, %20 : vector<2x512xf32>
      %22 = arith.truncf %21 : vector<2x512xf32> to vector<2x512xbf16>
      %c0_17 = arith.constant 0 : index
      %c0_18 = arith.constant 0 : index
      %23 = vector.load %arg4[%c0_17, %c0_18] : memref<512x128xbf16, #tpu.memory_space<vmem>>, vector<512x128xbf16>
      %cst_19 = arith.constant dense<0.000000e+00> : vector<2x128xf32>
      %24 = tpu.matmul %22, %23, %cst_19 {dimension_numbers = #tpu.dot_dimension_numbers<[1], [0], [0], [1], [0, 0, 1, 1], [], []>} : vector<2x512xbf16>, vector<512x128xbf16>, vector<2x128xf32> -> vector<2x128xf32>
      %c0_20 = arith.constant 0 : index
      %c0_21 = arith.constant 0 : index
      %25 = vector.load %arg5[%c0_20, %c0_21] : memref<1x128xf32, #tpu.memory_space<vmem>>, vector<1x128xf32>
      %26 = vector.broadcast %25 : vector<1x128xf32> to vector<2x128xf32>
      %27 = arith.addf %24, %26 : vector<2x128xf32>
      %c0_22 = arith.constant 0 : index
      %c0_23 = arith.constant 0 : index
      %28 = vector.load %arg6[%c0_22, %c0_23] : memref<2x128xf32, #tpu.memory_space<vmem>>, vector<2x128xf32>
      tpu.vector_store %arg6[%c0_22, %c0_23], %27 {strides = array<i32>} : memref<2x128xf32, #tpu.memory_space<vmem>>, vector<2x128xf32>,
    } else {
    }
    return
  }
  func.func @transform_0(%arg0: i32) -> (i32, i32, i32) {
    %c0_i32 = arith.constant 0 : i32
    %c0_i32_0 = arith.constant 0 : i32
    %c0_i32_1 = arith.constant 0 : i32
    return %c0_i32, %arg0, %c0_i32_0 : i32, i32, i32
  }
  func.func @transform_1(%arg0: i32) -> (i32, i32) {
    %c0_i32 = arith.constant 0 : i32
    %c0_i32_0 = arith.constant 0 : i32
    return %arg0, %c0_i32 : i32, i32
  }
  func.func @transform_2(%arg0: i32) -> (i32, i32) {
    %c0_i32 = arith.constant 0 : i32
    %c0_i32_0 = arith.constant 0 : i32
    %c0_i32_1 = arith.constant 0 : i32
    return %c0_i32, %c0_i32_0 : i32, i32
  }
  func.func @transform_3(%arg0: i32) -> (i32, i32) {
    %c0_i32 = arith.constant 0 : i32
    %c0_i32_0 = arith.constant 0 : i32
    %c0_i32_1 = arith.constant 0 : i32
    return %c0_i32, %c0_i32_0 : i32, i32
  }
  func.func @transform_4(%arg0: i32) -> (i32, i32) {
    %c0_i32 = arith.constant 0 : i32
    %c0_i32_0 = arith.constant 0 : i32
    %c0_i32_1 = arith.constant 0 : i32
    return %c0_i32, %c0_i32_0 : i32, i32
  }
  func.func @transform_5(%arg0: i32) -> (i32, i32) {
    %c0_i32 = arith.constant 0 : i32
    %c0_i32_0 = arith.constant 0 : i32
    %c0_i32_1 = arith.constant 0 : i32
    return %c0_i32, %c0_i32_0 : i32, i32
  }
}

</mosaic_0001>

<bundles_post_ra>
// kernel: skin_classifier_head.1
= control target key start
LH: loop header
LB: loop body
LE: loop exit
PB: predicated region body
PF: predicated region fallthrough
CT: control target
= control target key end

     0   :  { %10 = vsyncpa [#allocation5], 0  ;;  %s4371_s18 = smov 0   ;;  %s4373_s19 = smov 0   ;;  %s5715_s0 = inlined_call_operand.vmem [shape: f32[2,2048,16], index: 0, kind: input, shape index: {}]   ;;  %s5716_s1 = inlined_call_operand.vmem [shape: bf16[2048,512], index: 1, kind: input, shape index: {}]   ;;  %s5717_s2 = inlined_call_operand.vmem [shape: f32[1,512], index: 2, kind: input, shape index: {}]   ;;  %s5718_s3 = inlined_call_operand.vmem [shape: bf16[512,128], index: 3, kind: input, shape index: {}]   ;;  %s5719_s4 = inlined_call_operand.vmem [shape: f32[1,128], index: 4, kind: input, shape index: {}]   ;;  %s5720_s5 = inlined_call_operand.hbm [shape: f32[2,128], index: 5, kind: output, shape index: {}]  }
   0x1   :  { %s4375_s20 = smov 0  }
   0x2 LB: > { %s4387_s21 = sadd.s32 4294967295, %s4336_s20   ;;  %s4390_s22 = sadd.s32 1, %s4336_s20   ;;  %s4336_s20 = sphi %s4375_s20, %s5723_s20   ;;  %s4332_s19 = sphi %s4373_s19, %s5722_s19   ;;  %s4328_s18 = sphi %s4371_s18, %s5721_s18  }
   0x3   : > { %s20_s23 = ssub.s32 %s4336_s20, %s4390_s22  ;;  %s23_s24 = sadd.s32 1, %s4332_s19 }
   0x4   : > { %p21_p0 = scmp.eq.s32.totalorder %s20_s23, 0  ;;  %p30_p1 = scmp.ne.s32.totalorder %s4332_s19, %s4328_s18 }
   0x5   : > { %p31_p2 = scmp.eq.s32.totalorder %s4336_s20, 0  ;;  %p3797_p4 = scmp.ge.s32.totalorder %s4336_s20, 4 }
   0x6   : > { %s4399_s25 = scalar_select %p21_p0, %s4332_s19, %s23_s24  }
   0x7   : > { %p32_p3 = por %p31_p2, %p30_p1  ;;  %175 = sbr.rel (%p3797_p4) target bundleno = 82 (0x52), region = 28 }
   0xe   : > { %178 = sbr.rel (!%p32_p3) target bundleno = 82 (0x52), region = 32  ;;  %s180_s26 = sand.u32 (%p32_p3), 1, %s4332_s19  }
   0xf   : > { %s3973_s27 = sshll.u32 (%p32_p3), %s4336_s20, 9  ;;  %s3798_s28 = sshll.u32 (%p32_p3), %s180_s26, 10 }
  0x10   : > { %s4407_s6 = scalar_lea.vmem (%p32_p3), %s5715_s0, %s3973_s27  ;;  %s4412_s7 = scalar_lea.vmem (%p32_p3), [#allocation3], %s3798_s28 }
  0x11   : > { %v467_v0 = vld [vmem:[%s4407_s6] sm:$0xff] (%p32_p3)  ;;  %v469_v1 = vld [vmem:[%s4407_s6 + $0x8] sm:$0xff] (%p32_p3)  ;;  %v471_v2 = vld [vmem:[%s4407_s6 + $0x10] sm:$0xff] (%p32_p3) }
  0x12   : > { %468 = vst [vmem:[%s4412_s7] sm:$0xff] (%p32_p3), %v467_v0  ;;  %470 = vst [vmem:[%s4412_s7 + $0x8] sm:$0xff] (%p32_p3), %v469_v1  ;;  %v473_v3 = vld [vmem:[%s4407_s6 + $0x18] sm:$0xff] (%p32_p3)  ;;  %v475_v4 = vld [vmem:[%s4407_s6 + $0x20] sm:$0xff] (%p32_p3) }
  0x13   : > { %472 = vst [vmem:[%s4412_s7 + $0x10] sm:$0xff] (%p32_p3), %v471_v2  ;;  %v477_v5 = vld [vmem:[%s4407_s6 + $0x28] sm:$0xff] (%p32_p3)  ;;  %474 = vst [vmem:[%s4412_s7 + $0x18] sm:$0xff] (%p32_p3), %v473_v3  ;;  %v479_v6 = vld [vmem:[%s4407_s6 + $0x30] sm:$0xff] (%p32_p3) }
  0x14   : > { %476 = vst [vmem:[%s4412_s7 + $0x20] sm:$0xff] (%p32_p3), %v475_v4  ;;  %478 = vst [vmem:[%s4412_s7 + $0x28] sm:$0xff] (%p32_p3), %v477_v5  ;;  %v481_v7 = vld [vmem:[%s4407_s6 + $0x38] sm:$0xff] (%p32_p3)  ;;  %v483_v8 = vld [vmem:[%s4407_s6 + $0x40] sm:$0xff] (%p32_p3) }
  0x15   : > { %480 = vst [vmem:[%s4412_s7 + $0x30] sm:$0xff] %v479_v6  ;;  %482 = vst [vmem:[%s4412_s7 + $0x38] sm:$0xff] %v481_v7  ;;  %v485_v9 = vld [vmem:[%s4407_s6 + $0x48] sm:$0xff]  ;;  %v487_v10 = vld [vmem:[%s4407_s6 + $0x50] sm:$0xff] }
  0x16   : > { %484 = vst [vmem:[%s4412_s7 + $0x40] sm:$0xff] %v483_v8  ;;  %v489_v11 = vld [vmem:[%s4407_s6 + $0x58] sm:$0xff]  ;;  %486 = vst [vmem:[%s4412_s7 + $0x48] sm:$0xff] %v485_v9  ;;  %v491_v12 = vld [vmem:[%s4407_s6 + $0x60] sm:$0xff] }
  0x17   : > { %488 = vst [vmem:[%s4412_s7 + $0x50] sm:$0xff] %v487_v10  ;;  %490 = vst [vmem:[%s4412_s7 + $0x58] sm:$0xff] %v489_v11  ;;  %v493_v13 = vld [vmem:[%s4407_s6 + $0x68] sm:$0xff]  ;;  %v495_v14 = vld [vmem:[%s4407_s6 + $0x70] sm:$0xff] }
  0x18   : > { %492 = vst [vmem:[%s4412_s7 + $0x60] sm:$0xff] %v491_v12  ;;  %494 = vst [vmem:[%s4412_s7 + $0x68] sm:$0xff] %v493_v13  ;;  %v497_v15 = vld [vmem:[%s4407_s6 + $0x78] sm:$0xff]  ;;  %v499_v16 = vld [vmem:[%s4407_s6 + $0x80] sm:$0xff] }
  0x19   : > { %496 = vst [vmem:[%s4412_s7 + $0x70] sm:$0xff] %v495_v14  ;;  %v501_v17 = vld [vmem:[%s4407_s6 + $0x88] sm:$0xff]  ;;  %498 = vst [vmem:[%s4412_s7 + $0x78] sm:$0xff] %v497_v15  ;;  %v503_v18 = vld [vmem:[%s4407_s6 + $0x90] sm:$0xff] }
  0x1a   : > { %500 = vst [vmem:[%s4412_s7 + $0x80] sm:$0xff] %v499_v16  ;;  %502 = vst [vmem:[%s4412_s7 + $0x88] sm:$0xff] %v501_v17  ;;  %v505_v19 = vld [vmem:[%s4407_s6 + $0x98] sm:$0xff]  ;;  %v507_v20 = vld [vmem:[%s4407_s6 + $0xa0] sm:$0xff] }
  0x1b   : > { %504 = vst [vmem:[%s4412_s7 + $0x90] sm:$0xff] %v503_v18  ;;  %506 = vst [vmem:[%s4412_s7 + $0x98] sm:$0xff] %v505_v19  ;;  %v509_v21 = vld [vmem:[%s4407_s6 + $0xa8] sm:$0xff]  ;;  %v511_v22 = vld [vmem:[%s4407_s6 + $0xb0] sm:$0xff] }
  0x1c   : > { %508 = vst [vmem:[%s4412_s7 + $0xa0] sm:$0xff] %v507_v20  ;;  %v513_v23 = vld [vmem:[%s4407_s6 + $0xb8] sm:$0xff]  ;;  %510 = vst [vmem:[%s4412_s7 + $0xa8] sm:$0xff] %v509_v21  ;;  %v515_v24 = vld [vmem:[%s4407_s6 + $0xc0] sm:$0xff] }
  0x1d   : > { %512 = vst [vmem:[%s4412_s7 + $0xb0] sm:$0xff] %v511_v22  ;;  %514 = vst [vmem:[%s4412_s7 + $0xb8] sm:$0xff] %v513_v23  ;;  %v517_v25 = vld [vmem:[%s4407_s6 + $0xc8] sm:$0xff]  ;;  %v519_v26 = vld [vmem:[%s4407_s6 + $0xd0] sm:$0xff] }
  0x1e   : > { %516 = vst [vmem:[%s4412_s7 + $0xc0] sm:$0xff] %v515_v24  ;;  %518 = vst [vmem:[%s4412_s7 + $0xc8] sm:$0xff] %v517_v25  ;;  %v521_v27 = vld [vmem:[%s4407_s6 + $0xd8] sm:$0xff]  ;;  %v523_v28 = vld [vmem:[%s4407_s6 + $0xe0] sm:$0xff] }
  0x1f   : > { %520 = vst [vmem:[%s4412_s7 + $0xd0] sm:$0xff] %v519_v26  ;;  %v525_v29 = vld [vmem:[%s4407_s6 + $0xe8] sm:$0xff]  ;;  %522 = vst [vmem:[%s4412_s7 + $0xd8] sm:$0xff] %v521_v27  ;;  %v527_v30 = vld [vmem:[%s4407_s6 + $0xf0] sm:$0xff] }
  0x20   : > { %524 = vst [vmem:[%s4412_s7 + $0xe0] sm:$0xff] %v523_v28  ;;  %526 = vst [vmem:[%s4412_s7 + $0xe8] sm:$0xff] %v525_v29  ;;  %v529_v31 = vld [vmem:[%s4407_s6 + $0xf8] sm:$0xff]  ;;  %v531_v32 = vld [vmem:[%s4407_s6 + $0x100] sm:$0xff] }
  0x21   : > { %528 = vst [vmem:[%s4412_s7 + $0xf0] sm:$0xff] %v527_v30  ;;  %530 = vst [vmem:[%s4412_s7 + $0xf8] sm:$0xff] %v529_v31  ;;  %v533_v33 = vld [vmem:[%s4407_s6 + $0x108] sm:$0xff]  ;;  %v535_v34 = vld [vmem:[%s4407_s6 + $0x110] sm:$0xff] }
  0x22   : > { %532 = vst [vmem:[%s4412_s7 + $0x100] sm:$0xff] %v531_v32  ;;  %v537_v35 = vld [vmem:[%s4407_s6 + $0x118] sm:$0xff]  ;;  %534 = vst [vmem:[%s4412_s7 + $0x108] sm:$0xff] %v533_v33  ;;  %v539_v36 = vld [vmem:[%s4407_s6 + $0x120] sm:$0xff] }
  0x23   : > { %536 = vst [vmem:[%s4412_s7 + $0x110] sm:$0xff] %v535_v34  ;;  %538 = vst [vmem:[%s4412_s7 + $0x118] sm:$0xff] %v537_v35  ;;  %v541_v37 = vld [vmem:[%s4407_s6 + $0x128] sm:$0xff]  ;;  %v543_v38 = vld [vmem:[%s4407_s6 + $0x130] sm:$0xff] }
  0x24   : > { %540 = vst [vmem:[%s4412_s7 + $0x120] sm:$0xff] %v539_v36  ;;  %542 = vst [vmem:[%s4412_s7 + $0x128] sm:$0xff] %v541_v37  ;;  %v545_v39 = vld [vmem:[%s4407_s6 + $0x138] sm:$0xff]  ;;  %v547_v40 = vld [vmem:[%s4407_s6 + $0x140] sm:$0xff] }
  0x25   : > { %544 = vst [vmem:[%s4412_s7 + $0x130] sm:$0xff] %v543_v38  ;;  %v549_v41 = vld [vmem:[%s4407_s6 + $0x148] sm:$0xff]  ;;  %546 = vst [vmem:[%s4412_s7 + $0x138] sm:$0xff] %v545_v39  ;;  %v551_v42 = vld [vmem:[%s4407_s6 + $0x150] sm:$0xff] }
  0x26   : > { %548 = vst [vmem:[%s4412_s7 + $0x140] sm:$0xff] %v547_v40  ;;  %550 = vst [vmem:[%s4412_s7 + $0x148] sm:$0xff] %v549_v41  ;;  %v553_v43 = vld [vmem:[%s4407_s6 + $0x158] sm:$0xff]  ;;  %v555_v44 = vld [vmem:[%s4407_s6 + $0x160] sm:$0xff] }
  0x27   : > { %552 = vst [vmem:[%s4412_s7 + $0x150] sm:$0xff] %v551_v42  ;;  %554 = vst [vmem:[%s4412_s7 + $0x158] sm:$0xff] %v553_v43  ;;  %v557_v45 = vld [vmem:[%s4407_s6 + $0x168] sm:$0xff]  ;;  %v559_v46 = vld [vmem:[%s4407_s6 + $0x170] sm:$0xff] }
  0x28   : > { %556 = vst [vmem:[%s4412_s7 + $0x160] sm:$0xff] %v555_v44  ;;  %v561_v47 = vld [vmem:[%s4407_s6 + $0x178] sm:$0xff]  ;;  %558 = vst [vmem:[%s4412_s7 + $0x168] sm:$0xff] %v557_v45  ;;  %v563_v48 = vld [vmem:[%s4407_s6 + $0x180] sm:$0xff] }
  0x29   : > { %560 = vst [vmem:[%s4412_s7 + $0x170] sm:$0xff] %v559_v46  ;;  %562 = vst [vmem:[%s4412_s7 + $0x178] sm:$0xff] %v561_v47  ;;  %v565_v49 = vld [vmem:[%s4407_s6 + $0x188] sm:$0xff]  ;;  %v567_v50 = vld [vmem:[%s4407_s6 + $0x190] sm:$0xff] }
  0x2a   : > { %564 = vst [vmem:[%s4412_s7 + $0x180] sm:$0xff] %v563_v48  ;;  %566 = vst [vmem:[%s4412_s7 + $0x188] sm:$0xff] %v565_v49  ;;  %v569_v51 = vld [vmem:[%s4407_s6 + $0x198] sm:$0xff]  ;;  %v571_v52 = vld [vmem:[%s4407_s6 + $0x1a0] sm:$0xff] }
  0x2b   : > { %568 = vst [vmem:[%s4412_s7 + $0x190] sm:$0xff] %v567_v50  ;;  %v573_v53 = vld [vmem:[%s4407_s6 + $0x1a8] sm:$0xff]  ;;  %570 = vst [vmem:[%s4412_s7 + $0x198] sm:$0xff] %v569_v51  ;;  %v575_v54 = vld [vmem:[%s4407_s6 + $0x1b0] sm:$0xff] }
  0x2c   : > { %572 = vst [vmem:[%s4412_s7 + $0x1a0] sm:$0xff] %v571_v52  ;;  %574 = vst [vmem:[%s4412_s7 + $0x1a8] sm:$0xff] %v573_v53  ;;  %v577_v55 = vld [vmem:[%s4407_s6 + $0x1b8] sm:$0xff]  ;;  %v579_v56 = vld [vmem:[%s4407_s6 + $0x1c0] sm:$0xff] }
  0x2d   : > { %576 = vst [vmem:[%s4412_s7 + $0x1b0] sm:$0xff] %v575_v54  ;;  %578 = vst [vmem:[%s4412_s7 + $0x1b8] sm:$0xff] %v577_v55  ;;  %v581_v57 = vld [vmem:[%s4407_s6 + $0x1c8] sm:$0xff]  ;;  %v583_v58 = vld [vmem:[%s4407_s6 + $0x1d0] sm:$0xff] }
  0x2e   : > { %580 = vst [vmem:[%s4412_s7 + $0x1c0] sm:$0xff] %v579_v56  ;;  %v585_v59 = vld [vmem:[%s4407_s6 + $0x1d8] sm:$0xff]  ;;  %582 = vst [vmem:[%s4412_s7 + $0x1c8] sm:$0xff] %v581_v57  ;;  %v587_v60 = vld [vmem:[%s4407_s6 + $0x1e0] sm:$0xff] }
  0x2f   : > { %584 = vst [vmem:[%s4412_s7 + $0x1d0] sm:$0xff] %v583_v58  ;;  %586 = vst [vmem:[%s4412_s7 + $0x1d8] sm:$0xff] %v585_v59  ;;  %v589_v61 = vld [vmem:[%s4407_s6 + $0x1e8] sm:$0xff]  ;;  %v591_v62 = vld [vmem:[%s4407_s6 + $0x1f0] sm:$0xff] }
  0x30   : > { %588 = vst [vmem:[%s4412_s7 + $0x1e0] sm:$0xff] %v587_v60  ;;  %590 = vst [vmem:[%s4412_s7 + $0x1e8] sm:$0xff] %v589_v61  ;;  %v593_v63 = vld [vmem:[%s4407_s6 + $0x1f8] sm:$0xff]  ;;  %v595_v0 = vld [vmem:[%s4407_s6 + $0x800] sm:$0xff] }
  0x31   : > { %592 = vst [vmem:[%s4412_s7 + $0x1f0] sm:$0xff] %v591_v62  ;;  %v597_v1 = vld [vmem:[%s4407_s6 + $0x808] sm:$0xff]  ;;  %594 = vst [vmem:[%s4412_s7 + $0x1f8] sm:$0xff] %v593_v63  ;;  %v599_v2 = vld [vmem:[%s4407_s6 + $0x810] sm:$0xff] }
  0x32   : > { %596 = vst [vmem:[%s4412_s7 + $0x200] sm:$0xff] %v595_v0  ;;  %598 = vst [vmem:[%s4412_s7 + $0x208] sm:$0xff] %v597_v1  ;;  %v601_v3 = vld [vmem:[%s4407_s6 + $0x818] sm:$0xff]  ;;  %v603_v4 = vld [vmem:[%s4407_s6 + $0x820] sm:$0xff] }
  0x33   : > { %600 = vst [vmem:[%s4412_s7 + $0x210] sm:$0xff] %v599_v2  ;;  %602 = vst [vmem:[%s4412_s7 + $0x218] sm:$0xff] %v601_v3  ;;  %v605_v5 = vld [vmem:[%s4407_s6 + $0x828] sm:$0xff]  ;;  %v607_v6 = vld [vmem:[%s4407_s6 + $0x830] sm:$0xff] }
  0x34   : > { %604 = vst [vmem:[%s4412_s7 + $0x220] sm:$0xff] %v603_v4  ;;  %v609_v7 = vld [vmem:[%s4407_s6 + $0x838] sm:$0xff]  ;;  %606 = vst [vmem:[%s4412_s7 + $0x228] sm:$0xff] %v605_v5  ;;  %v611_v8 = vld [vmem:[%s4407_s6 + $0x840] sm:$0xff] }
  0x35   : > { %608 = vst [vmem:[%s4412_s7 + $0x230] sm:$0xff] %v607_v6  ;;  %610 = vst [vmem:[%s4412_s7 + $0x238] sm:$0xff] %v609_v7  ;;  %v613_v9 = vld [vmem:[%s4407_s6 + $0x848] sm:$0xff]  ;;  %v615_v10 = vld [vmem:[%s4407_s6 + $0x850] sm:$0xff] }
  0x36   : > { %612 = vst [vmem:[%s4412_s7 + $0x240] sm:$0xff] %v611_v8  ;;  %614 = vst [vmem:[%s4412_s7 + $0x248] sm:$0xff] %v613_v9  ;;  %v617_v11 = vld [vmem:[%s4407_s6 + $0x858] sm:$0xff]  ;;  %v619_v12 = vld [vmem:[%s4407_s6 + $0x860] sm:$0xff] }
  0x37   : > { %616 = vst [vmem:[%s4412_s7 + $0x250] sm:$0xff] %v615_v10  ;;  %v621_v13 = vld [vmem:[%s4407_s6 + $0x868] sm:$0xff]  ;;  %618 = vst [vmem:[%s4412_s7 + $0x258] sm:$0xff] %v617_v11  ;;  %v623_v14 = vld [vmem:[%s4407_s6 + $0x870] sm:$0xff] }
  0x38   : > { %620 = vst [vmem:[%s4412_s7 + $0x260] sm:$0xff] %v619_v12  ;;  %622 = vst [vmem:[%s4412_s7 + $0x268] sm:$0xff] %v621_v13  ;;  %v625_v15 = vld [vmem:[%s4407_s6 + $0x878] sm:$0xff]  ;;  %v627_v16 = vld [vmem:[%s4407_s6 + $0x880] sm:$0xff] }
  0x39   : > { %624 = vst [vmem:[%s4412_s7 + $0x270] sm:$0xff] %v623_v14  ;;  %626 = vst [vmem:[%s4412_s7 + $0x278] sm:$0xff] %v625_v15  ;;  %v629_v17 = vld [vmem:[%s4407_s6 + $0x888] sm:$0xff]  ;;  %v631_v18 = vld [vmem:[%s4407_s6 + $0x890] sm:$0xff] }
  0x3a   : > { %628 = vst [vmem:[%s4412_s7 + $0x280] sm:$0xff] %v627_v16  ;;  %v633_v19 = vld [vmem:[%s4407_s6 + $0x898] sm:$0xff]  ;;  %630 = vst [vmem:[%s4412_s7 + $0x288] sm:$0xff] %v629_v17  ;;  %v635_v20 = vld [vmem:[%s4407_s6 + $0x8a0] sm:$0xff] }
  0x3b   : > { %632 = vst [vmem:[%s4412_s7 + $0x290] sm:$0xff] %v631_v18  ;;  %634 = vst [vmem:[%s4412_s7 + $0x298] sm:$0xff] %v633_v19  ;;  %v637_v21 = vld [vmem:[%s4407_s6 + $0x8a8] sm:$0xff]  ;;  %v639_v22 = vld [vmem:[%s4407_s6 + $0x8b0] sm:$0xff] }
  0x3c   : > { %636 = vst [vmem:[%s4412_s7 + $0x2a0] sm:$0xff] %v635_v20  ;;  %638 = vst [vmem:[%s4412_s7 + $0x2a8] sm:$0xff] %v637_v21  ;;  %v641_v23 = vld [vmem:[%s4407_s6 + $0x8b8] sm:$0xff]  ;;  %v643_v24 = vld [vmem:[%s4407_s6 + $0x8c0] sm:$0xff] }
  0x3d   : > { %640 = vst [vmem:[%s4412_s7 + $0x2b0] sm:$0xff] %v639_v22  ;;  %v645_v25 = vld [vmem:[%s4407_s6 + $0x8c8] sm:$0xff]  ;;  %642 = vst [vmem:[%s4412_s7 + $0x2b8] sm:$0xff] %v641_v23  ;;  %v647_v26 = vld [vmem:[%s4407_s6 + $0x8d0] sm:$0xff] }
  0x3e   : > { %644 = vst [vmem:[%s4412_s7 + $0x2c0] sm:$0xff] %v643_v24  ;;  %646 = vst [vmem:[%s4412_s7 + $0x2c8] sm:$0xff] %v645_v25  ;;  %v649_v27 = vld [vmem:[%s4407_s6 + $0x8d8] sm:$0xff]  ;;  %v651_v28 = vld [vmem:[%s4407_s6 + $0x8e0] sm:$0xff] }
  0x3f   : > { %648 = vst [vmem:[%s4412_s7 + $0x2d0] sm:$0xff] %v647_v26  ;;  %650 = vst [vmem:[%s4412_s7 + $0x2d8] sm:$0xff] %v649_v27  ;;  %v653_v29 = vld [vmem:[%s4407_s6 + $0x8e8] sm:$0xff]  ;;  %v655_v30 = vld [vmem:[%s4407_s6 + $0x8f0] sm:$0xff] }
  0x40   : > { %652 = vst [vmem:[%s4412_s7 + $0x2e0] sm:$0xff] %v651_v28  ;;  %v657_v31 = vld [vmem:[%s4407_s6 + $0x8f8] sm:$0xff]  ;;  %654 = vst [vmem:[%s4412_s7 + $0x2e8] sm:$0xff] %v653_v29  ;;  %v659_v32 = vld [vmem:[%s4407_s6 + $0x900] sm:$0xff] }
  0x41   : > { %656 = vst [vmem:[%s4412_s7 + $0x2f0] sm:$0xff] %v655_v30  ;;  %658 = vst [vmem:[%s4412_s7 + $0x2f8] sm:$0xff] %v657_v31  ;;  %v661_v33 = vld [vmem:[%s4407_s6 + $0x908] sm:$0xff]  ;;  %v663_v34 = vld [vmem:[%s4407_s6 + $0x910] sm:$0xff] }
  0x42   : > { %660 = vst [vmem:[%s4412_s7 + $0x300] sm:$0xff] %v659_v32  ;;  %662 = vst [vmem:[%s4412_s7 + $0x308] sm:$0xff] %v661_v33  ;;  %v665_v35 = vld [vmem:[%s4407_s6 + $0x918] sm:$0xff]  ;;  %v667_v36 = vld [vmem:[%s4407_s6 + $0x920] sm:$0xff] }
  0x43   : > { %664 = vst [vmem:[%s4412_s7 + $0x310] sm:$0xff] %v663_v34  ;;  %v669_v37 = vld [vmem:[%s4407_s6 + $0x928] sm:$0xff]  ;;  %666 = vst [vmem:[%s4412_s7 + $0x318] sm:$0xff] %v665_v35  ;;  %v671_v38 = vld [vmem:[%s4407_s6 + $0x930] sm:$0xff] }
  0x44   : > { %668 = vst [vmem:[%s4412_s7 + $0x320] sm:$0xff] %v667_v36  ;;  %670 = vst [vmem:[%s4412_s7 + $0x328] sm:$0xff] %v669_v37  ;;  %v673_v39 = vld [vmem:[%s4407_s6 + $0x938] sm:$0xff]  ;;  %v675_v40 = vld [vmem:[%s4407_s6 + $0x940] sm:$0xff] }
  0x45   : > { %672 = vst [vmem:[%s4412_s7 + $0x330] sm:$0xff] %v671_v38  ;;  %674 = vst [vmem:[%s4412_s7 + $0x338] sm:$0xff] %v673_v39  ;;  %v677_v41 = vld [vmem:[%s4407_s6 + $0x948] sm:$0xff]  ;;  %v679_v42 = vld [vmem:[%s4407_s6 + $0x950] sm:$0xff] }
  0x46   : > { %676 = vst [vmem:[%s4412_s7 + $0x340] sm:$0xff] %v675_v40  ;;  %v681_v43 = vld [vmem:[%s4407_s6 + $0x958] sm:$0xff]  ;;  %678 = vst [vmem:[%s4412_s7 + $0x348] sm:$0xff] %v677_v41  ;;  %v683_v44 = vld [vmem:[%s4407_s6 + $0x960] sm:$0xff] }
  0x47   : > { %680 = vst [vmem:[%s4412_s7 + $0x350] sm:$0xff] %v679_v42  ;;  %682 = vst [vmem:[%s4412_s7 + $0x358] sm:$0xff] %v681_v43  ;;  %v685_v45 = vld [vmem:[%s4407_s6 + $0x968] sm:$0xff]  ;;  %v687_v46 = vld [vmem:[%s4407_s6 + $0x970] sm:$0xff] }
  0x48   : > { %684 = vst [vmem:[%s4412_s7 + $0x360] sm:$0xff] %v683_v44  ;;  %686 = vst [vmem:[%s4412_s7 + $0x368] sm:$0xff] %v685_v45  ;;  %v689_v47 = vld [vmem:[%s4407_s6 + $0x978] sm:$0xff]  ;;  %v691_v48 = vld [vmem:[%s4407_s6 + $0x980] sm:$0xff] }
  0x49   : > { %688 = vst [vmem:[%s4412_s7 + $0x370] sm:$0xff] %v687_v46  ;;  %v693_v49 = vld [vmem:[%s4407_s6 + $0x988] sm:$0xff]  ;;  %690 = vst [vmem:[%s4412_s7 + $0x378] sm:$0xff] %v689_v47  ;;  %v695_v50 = vld [vmem:[%s4407_s6 + $0x990] sm:$0xff] }
  0x4a   : > { %692 = vst [vmem:[%s4412_s7 + $0x380] sm:$0xff] %v691_v48  ;;  %694 = vst [vmem:[%s4412_s7 + $0x388] sm:$0xff] %v693_v49  ;;  %v697_v51 = vld [vmem:[%s4407_s6 + $0x998] sm:$0xff]  ;;  %v699_v52 = vld [vmem:[%s4407_s6 + $0x9a0] sm:$0xff] }
  0x4b   : > { %696 = vst [vmem:[%s4412_s7 + $0x390] sm:$0xff] %v695_v50  ;;  %698 = vst [vmem:[%s4412_s7 + $0x398] sm:$0xff] %v697_v51  ;;  %v701_v53 = vld [vmem:[%s4407_s6 + $0x9a8] sm:$0xff]  ;;  %v703_v54 = vld [vmem:[%s4407_s6 + $0x9b0] sm:$0xff] }
  0x4c   : > { %700 = vst [vmem:[%s4412_s7 + $0x3a0] sm:$0xff] %v699_v52  ;;  %v705_v55 = vld [vmem:[%s4407_s6 + $0x9b8] sm:$0xff]  ;;  %702 = vst [vmem:[%s4412_s7 + $0x3a8] sm:$0xff] %v701_v53  ;;  %v707_v56 = vld [vmem:[%s4407_s6 + $0x9c0] sm:$0xff] }
  0x4d   : > { %704 = vst [vmem:[%s4412_s7 + $0x3b0] sm:$0xff] %v703_v54  ;;  %706 = vst [vmem:[%s4412_s7 + $0x3b8] sm:$0xff] %v705_v55  ;;  %v709_v57 = vld [vmem:[%s4407_s6 + $0x9c8] sm:$0xff]  ;;  %v711_v58 = vld [vmem:[%s4407_s6 + $0x9d0] sm:$0xff] }
  0x4e   : > { %708 = vst [vmem:[%s4412_s7 + $0x3c0] sm:$0xff] %v707_v56  ;;  %710 = vst [vmem:[%s4412_s7 + $0x3c8] sm:$0xff] %v709_v57  ;;  %v713_v59 = vld [vmem:[%s4407_s6 + $0x9d8] sm:$0xff]  ;;  %v715_v60 = vld [vmem:[%s4407_s6 + $0x9e0] sm:$0xff] }
  0x4f   : > { %712 = vst [vmem:[%s4412_s7 + $0x3d0] sm:$0xff] %v711_v58  ;;  %v717_v61 = vld [vmem:[%s4407_s6 + $0x9e8] sm:$0xff]  ;;  %714 = vst [vmem:[%s4412_s7 + $0x3d8] sm:$0xff] %v713_v59  ;;  %v719_v62 = vld [vmem:[%s4407_s6 + $0x9f0] sm:$0xff] }
  0x50   : > { %716 = vst [vmem:[%s4412_s7 + $0x3e0] sm:$0xff] %v715_v60  ;;  %718 = vst [vmem:[%s4412_s7 + $0x3e8] sm:$0xff] %v717_v61  ;;  %v721_v63 = vld [vmem:[%s4407_s6 + $0x9f8] sm:$0xff] }
  0x51   : > { %720 = vst [vmem:[%s4412_s7 + $0x3f0] sm:$0xff] %v719_v62  ;;  %722 = vst [vmem:[%s4412_s7 + $0x3f8] sm:$0xff] %v721_v63 }
  0x52 PF: > { %p3801_p5 = scmp.ge.s32.totalorder %s4336_s20, 1  ;;  %p737_p6 = scmp.lt.s32.totalorder %s4336_s20, 5 }
  0x54   : > { %p738_p7 = pnand %p3801_p5, %p737_p6 }
  0x55   : > { %s744_s8 = sand.u32 (!%p738_p7), 1, %s4328_s18   ;;  %s3803_s9 = sshll.u32 (!%p738_p7), %s4387_s21, 6 }
  0x56   : > { %741 = sbr.rel (%p738_p7) target bundleno = 995 (0x3e3), region = 74  ;;  %s3802_s10 = sshll.u32 (!%p738_p7), %s744_s8, 10 }
  0x57   : > { %p774_p8 = scmp.lt.s32.totalorder (!%p738_p7), %s3803_s9, 255  ;;  %s4676_s15 = scalar_lea.vmem (!%p738_p7), [#allocation3], %s3802_s10 }
  0x58   : > { %p3806_p9 = scmp.ne.s32.totalorder (!%p738_p7), %s4387_s21, 0 }
  0x5d   : > { %s5725_s9 = smov (!%p774_p8, %s3803_s9), 255  ;;  %784 = sbr.rel (%p3806_p9) target bundleno = 100 (0x64), region = 82 }
  0x5e   : > { %s3974_s11 = sshll.u32 %s5725_s9, 4  ;;  %v4338_v0 = vmov (!%p3806_p9), 0.0  }
  0x5f   : > { %s4674_s14 = scalar_lea.vmem %s5716_s1, %s3974_s11  ;;  %785 = vst [vmem:[#allocation2] sm:$0xff] (!%p3806_p9), %v4338_v0 }
  0x64 PF: > { %v866_v1 = vld [vmem:[%s4676_s15 + $0x280] sm:$0xff]  ;;  %vm914_vm0 = vcmask 130048   ;;  %v867_v3 = vld [vmem:[%s4676_s15 + $0x288] sm:$0xff]  ;;  %v805_v13 = vld [vmem:[%s4676_s15 + $0x98] sm:$0xff]  ;;  %vm1824_vm1 = vcmask 130112   ;;  %vm1831_vm2 = vcmask 195712  }
  0x65   : > { %v802_v2 = vld [vmem:[%s4676_s15 + $0x80] sm:$0xff]  ;;  %v1155_v4 = vsel %vm914_vm0, %v866_v1, 0.0  ;;  %v803_v6 = vld [vmem:[%s4676_s15 + $0x88] sm:$0xff]  ;;  %v1158_v7 = vsel %vm914_vm0, %v867_v3, 0.0  ;;  %v804_v14 = vld [vmem:[%s4676_s15 + $0x90] sm:$0xff]  ;;  %v972_v15 = vsel %vm914_vm0, %v805_v13, 0.0 }
  0x66   : > { %v963_v5 = vsel %vm914_vm0, %v802_v2, 0.0  ;;  %1156 = vadd.xlane.f32.xlu1 %v1155_v4  ;;  %v966_v8 = vsel %vm914_vm0, %v803_v6, 0.0  ;;  %v787_v9 = vld [vmem:[%s4676_s15 + $0x8] sm:$0xff]  ;;  %v786_v10 = vld [vmem:[%s4676_s15] sm:$0xff]  ;;  %v969_v16 = vsel %vm914_vm0, %v804_v14, 0.0  ;;  %v869_v21 = vld [vmem:[%s4676_s15 + $0x298] sm:$0xff] }
  0x67   : > { %964 = vadd.xlane.f32.xlu0 %v963_v5  ;;  %v918_v11 = vsel %vm914_vm0, %v787_v9, 0.0  ;;  %v915_v12 = vsel %vm914_vm0, %v786_v10, 0.0  ;;  %v851_v17 = vld [vmem:[%s4676_s15 + $0x208] sm:$0xff]  ;;  %v850_v18 = vld [vmem:[%s4676_s15 + $0x200] sm:$0xff]  ;;  %v868_v22 = vld [vmem:[%s4676_s15 + $0x290] sm:$0xff]  ;;  %v1164_v23 = vsel %vm914_vm0, %v869_v21, 0.0 }
  0x68   : > { %v1110_v19 = vsel %vm914_vm0, %v851_v17, 0.0  ;;  %v1107_v20 = vsel %vm914_vm0, %v850_v18, 0.0  ;;  %v1161_v24 = vsel %vm914_vm0, %v868_v22, 0.0  ;;  %v789_v25 = vld [vmem:[%s4676_s15 + $0x18] sm:$0xff]  ;;  %v788_v26 = vld [vmem:[%s4676_s15 + $0x10] sm:$0xff]  ;;  %v807_v31 = vld [vmem:[%s4676_s15 + $0xa8] sm:$0xff] }
  0x69   : > { %v924_v27 = vsel %vm914_vm0, %v789_v25, 0.0  ;;  %v921_v28 = vsel %vm914_vm0, %v788_v26, 0.0  ;;  %v853_v29 = vld [vmem:[%s4676_s15 + $0x218] sm:$0xff]  ;;  %v852_v30 = vld [vmem:[%s4676_s15 + $0x210] sm:$0xff]  ;;  %v806_v32 = vld [vmem:[%s4676_s15 + $0xa0] sm:$0xff]  ;;  %v978_v37 = vsel %vm914_vm0, %v807_v31, 0.0 }
  0x6a   : > { %1159 = vadd.xlane.f32.xlu1 %v1158_v7  ;;  %v1116_v33 = vsel %vm914_vm0, %v853_v29, 0.0  ;;  %v1113_v34 = vsel %vm914_vm0, %v852_v30, 0.0  ;;  %v871_v35 = vld [vmem:[%s4676_s15 + $0x2a8] sm:$0xff]  ;;  %v870_v36 = vld [vmem:[%s4676_s15 + $0x2a0] sm:$0xff]  ;;  %v975_v38 = vsel %vm914_vm0, %v806_v32, 0.0  ;;  %v809_v47 = vld [vmem:[%s4676_s15 + $0xb8] sm:$0xff] }
  0x6b   : > { %967 = vadd.xlane.f32.xlu0 %v966_v8  ;;  %v791_v39 = vld [vmem:[%s4676_s15 + $0x28] sm:$0xff]  ;;  %v790_v40 = vld [vmem:[%s4676_s15 + $0x20] sm:$0xff]  ;;  %v1170_v41 = vsel %vm914_vm0, %v871_v35, 0.0  ;;  %v1167_v42 = vsel %vm914_vm0, %v870_v36, 0.0  ;;  %v808_v48 = vld [vmem:[%s4676_s15 + $0xb0] sm:$0xff]  ;;  %v984_v53 = vsel %vm914_vm0, %v809_v47, 0.0 }
  0x6c   : > { %v855_v43 = vld [vmem:[%s4676_s15 + $0x228] sm:$0xff]  ;;  %v854_v44 = vld [vmem:[%s4676_s15 + $0x220] sm:$0xff]  ;;  %v930_v45 = vsel %vm914_vm0, %v791_v39, 0.0  ;;  %v927_v46 = vsel %vm914_vm0, %v790_v40, 0.0  ;;  %v873_v51 = vld [vmem:[%s4676_s15 + $0x2b8] sm:$0xff]  ;;  %v981_v54 = vsel %vm914_vm0, %v808_v48, 0.0 }
  0x6d   : > { %v1122_v49 = vsel %vm914_vm0, %v855_v43, 0.0  ;;  %v1119_v50 = vsel %vm914_vm0, %v854_v44, 0.0  ;;  %v872_v52 = vld [vmem:[%s4676_s15 + $0x2b0] sm:$0xff]  ;;  %v793_v55 = vld [vmem:[%s4676_s15 + $0x38] sm:$0xff]  ;;  %v1176_v57 = vsel %vm914_vm0, %v873_v51, 0.0  ;;  %v811_v63 = vld [vmem:[%s4676_s15 + $0xc8] sm:$0xff] }
  0x6e   : > { %919 = vadd.xlane.f32.xlu1 %v918_v11  ;;  %v792_v56 = vld [vmem:[%s4676_s15 + $0x30] sm:$0xff]  ;;  %v1173_v58 = vsel %vm914_vm0, %v872_v52, 0.0  ;;  %v857_v59 = vld [vmem:[%s4676_s15 + $0x238] sm:$0xff]  ;;  %v936_v61 = vsel %vm914_vm0, %v793_v55, 0.0  ;;  %v810_v0 = vld [vmem:[%s4676_s15 + $0xc0] sm:$0xff]  ;;  %v990_v5 = vsel %vm914_vm0, %v811_v63, 0.0 }
  0x6f   : > { %916 = vadd.xlane.f32.xlu0 %v915_v12  ;;  %v856_v60 = vld [vmem:[%s4676_s15 + $0x230] sm:$0xff]  ;;  %v933_v62 = vsel %vm914_vm0, %v792_v56, 0.0  ;;  %v1128_v1 = vsel %vm914_vm0, %v857_v59, 0.0  ;;  %v875_v3 = vld [vmem:[%s4676_s15 + $0x2c8] sm:$0xff]  ;;  %v874_v4 = vld [vmem:[%s4676_s15 + $0x2c0] sm:$0xff]  ;;  %v987_v6 = vsel %vm914_vm0, %v810_v0, 0.0 }
  0x70   : > { %v1125_v2 = vsel %vm914_vm0, %v856_v60, 0.0  ;;  %v795_v7 = vld [vmem:[%s4676_s15 + $0x48] sm:$0xff]  ;;  %v794_v8 = vld [vmem:[%s4676_s15 + $0x40] sm:$0xff]  ;;  %v1182_v9 = vsel %vm914_vm0, %v875_v3, 0.0  ;;  %v1179_v10 = vsel %vm914_vm0, %v874_v4, 0.0  ;;  %v877_v21 = vld [vmem:[%s4676_s15 + $0x2d8] sm:$0xff] }
  0x71   : > { %v859_v11 = vld [vmem:[%s4676_s15 + $0x248] sm:$0xff]  ;;  %v858_v12 = vld [vmem:[%s4676_s15 + $0x240] sm:$0xff]  ;;  %v942_v13 = vsel %vm914_vm0, %v795_v7, 0.0  ;;  %v939_v14 = vsel %vm914_vm0, %v794_v8, 0.0  ;;  %v876_v22 = vld [vmem:[%s4676_s15 + $0x2d0] sm:$0xff]  ;;  %vm1838_vm3 = vcmask 261312  }
  0x72   : > { %973 = vadd.xlane.f32.xlu1 %v972_v15  ;;  %v813_v15 = vld [vmem:[%s4676_s15 + $0xd8] sm:$0xff]  ;;  %v1134_v17 = vsel %vm914_vm0, %v859_v11, 0.0  ;;  %v1131_v18 = vsel %vm914_vm0, %v858_v12, 0.0  ;;  %v796_v26 = vld [vmem:[%s4676_s15 + $0x50] sm:$0xff]  ;;  %vm1845_vm4 = vcmask 326912   ;;  %vm1852_vm5 = vcmask 392512  }
  0x73   : > { %970 = vadd.xlane.f32.xlu0 %v969_v16  ;;  %v812_v16 = vld [vmem:[%s4676_s15 + $0xd0] sm:$0xff]  ;;  %v797_v25 = vld [vmem:[%s4676_s15 + $0x58] sm:$0xff]  ;;  %vm1859_vm6 = vcmask 458112   ;;  %vm1866_vm7 = vcmask 523712   ;;  %vm1873_vm8 = vcmask 589312   ;;  %vm1880_vm9 = vcmask 654912  }
  0x74   : > { %v861_v29 = vld [vmem:[%s4676_s15 + $0x258] sm:$0xff]  ;;  %v860_v30 = vld [vmem:[%s4676_s15 + $0x250] sm:$0xff]  ;;  %vm1887_vm10 = vcmask 720512   ;;  %vm1894_vm11 = vcmask 786112   ;;  %vm1901_vm12 = vcmask 851712   ;;  %vm1908_vm13 = vcmask 917312  }
  0x75   : > { %v4060_v31 = vld [vmem:[%s4674_s14 + $0x4] ss:$16 sps:$4 sm:$0xff]   ;;  %v4062_v32 = vld [vmem:[%s4674_s14 + $0xc] ss:$16 sps:$4 sm:$0xff]   ;;  %v1140_v35 = vsel %vm914_vm0, %v861_v29, 0.0  ;;  %v1137_v36 = vsel %vm914_vm0, %v860_v30, 0.0 }
  0x76   : > { %1111 = vadd.xlane.f32.xlu1 %v1110_v19  ;;  %v996_v19 = vsel %vm914_vm0, %v813_v15, 0.0  ;;  %3130 = vmatprep.subr.bf16.mxu0 %v4060_v31  ;;  %v4066_v39 = vld [vmem:[%s4674_s14 + $0x24] ss:$16 sps:$4 sm:$0xff]   ;;  %v4068_v40 = vld [vmem:[%s4674_s14 + $0x2c] ss:$16 sps:$4 sm:$0xff]   ;;  %vm1915_vm14 = vcmask 982912  }
  0x77   : > { %1108 = vadd.xlane.f32.xlu0 %v1107_v20  ;;  %v993_v20 = vsel %vm914_vm0, %v812_v16, 0.0  ;;  %3212 = vmatprep.subr.bf16.mxu1 %v4062_v32  ;;  %v4072_v47 = vld [vmem:[%s4674_s14 + $0x44] ss:$16 sps:$4 sm:$0xff]   ;;  %v4074_v48 = vld [vmem:[%s4674_s14 + $0x4c] ss:$16 sps:$4 sm:$0xff]   ;;  %vm1922_vm15 = vcmask 1048512  }
  0x78   : > { %v4078_v55 = vld [vmem:[%s4674_s14 + $0x64] ss:$16 sps:$4 sm:$0xff]   ;;  %v4080_v56 = vld [vmem:[%s4674_s14 + $0x6c] ss:$16 sps:$4 sm:$0xff]   ;;  %p3935_p10 = scmp.ne.s32.totalorder %s4387_s21, 3 }
  0x79   : > { %v4084_v63 = vld [vmem:[%s4674_s14 + $0x84] ss:$16 sps:$4 sm:$0xff]   ;;  %v4086_v0 = vld [vmem:[%s4674_s14 + $0x8c] ss:$16 sps:$4 sm:$0xff]  }
  0x7a   : > { %1165 = vadd.xlane.f32.xlu1 %v1164_v23  ;;  %v1188_v23 = vsel %vm914_vm0, %v877_v21, 0.0  ;;  %v4090_v7 = vld [vmem:[%s4674_s14 + $0xa4] ss:$16 sps:$4 sm:$0xff]   ;;  %v4092_v8 = vld [vmem:[%s4674_s14 + $0xac] ss:$16 sps:$4 sm:$0xff]  }
  0x7b   : > { %1162 = vadd.xlane.f32.xlu0 %v1161_v24  ;;  %v1185_v24 = vsel %vm914_vm0, %v876_v22, 0.0  ;;  %v4096_v15 = vld [vmem:[%s4674_s14 + $0xc4] ss:$16 sps:$4 sm:$0xff]   ;;  %v4098_v16 = vld [vmem:[%s4674_s14 + $0xcc] ss:$16 sps:$4 sm:$0xff]  }
  0x7c   : > { %v801_v21 = vld [vmem:[%s4676_s15 + $0x78] sm:$0xff]  ;;  %v800_v22 = vld [vmem:[%s4676_s15 + $0x70] sm:$0xff] }
  0x7d   : > { %v865_v29 = vld [vmem:[%s4676_s15 + $0x278] sm:$0xff]  ;;  %v864_v30 = vld [vmem:[%s4676_s15 + $0x270] sm:$0xff] }
  0x7e   : > { %925 = vadd.xlane.f32.xlu1 %v924_v27  ;;  %v948_v27 = vsel %vm914_vm0, %v797_v25, 0.0  ;;  %v4106_v25 = vld [vmem:[%s4674_s14 + $0xe0] ss:$16 sps:$4 sm:$0xff]   ;;  %v4108_v31 = vld [vmem:[%s4674_s14 + $0x104] ss:$16 sps:$4 sm:$0xff]  }
  0x7f   : > { %922 = vadd.xlane.f32.xlu0 %v921_v28  ;;  %v945_v28 = vsel %vm914_vm0, %v796_v26, 0.0  ;;  %v4107_v26 = vld [vmem:[%s4674_s14 + $0xe8] ss:$16 sps:$4 sm:$0xff]   ;;  %v4110_v32 = vld [vmem:[%s4674_s14 + $0x10c] ss:$16 sps:$4 sm:$0xff]  }
  0x82   : > { %1117 = vadd.xlane.f32.xlu1 %v1116_v33  ;;  %v4064_v33 = vld [vmem:[%s4674_s14] ss:$16 sps:$4 sm:$0xff]  }
  0x83   : > { %1114 = vadd.xlane.f32.xlu0 %v1113_v34  ;;  %v4065_v34 = vld [vmem:[%s4674_s14 + $0x8] ss:$16 sps:$4 sm:$0xff]   ;;  %3131 = vmatpush1.bf16.msra.mxu0 %v4064_v33  ;;  %v4112_v33 = vld [vmem:[%s4674_s14 + $0x100] ss:$16 sps:$4 sm:$0xff]  }
  0x84   : > { %3213 = vmatpush1.bf16.msra.mxu1 %v4065_v34  ;;  %3132 = vmatprep.subr.bf16.mxu0 %v4066_v39  ;;  %v4113_v34 = vld [vmem:[%s4674_s14 + $0x108] ss:$16 sps:$4 sm:$0xff]   ;;  %v4114_v39 = vld [vmem:[%s4674_s14 + $0x124] ss:$16 sps:$4 sm:$0xff]  }
  0x85   : > { %3214 = vmatprep.subr.bf16.mxu1 %v4068_v40  ;;  %v4116_v40 = vld [vmem:[%s4674_s14 + $0x12c] ss:$16 sps:$4 sm:$0xff]  }
  0x86   : > { %979 = vadd.xlane.f32.xlu1 %v978_v37  ;;  %v815_v37 = vld [vmem:[%s4676_s15 + $0xe8] sm:$0xff] }
  0x87   : > { %976 = vadd.xlane.f32.xlu0 %v975_v38  ;;  %v814_v38 = vld [vmem:[%s4676_s15 + $0xe0] sm:$0xff]  ;;  %v1002_v43 = vsel %vm914_vm0, %v815_v37, 0.0  ;;  %v835_v37 = vld [vmem:[%s4676_s15 + $0x188] sm:$0xff] }
  0x88   : > { %v999_v44 = vsel %vm914_vm0, %v814_v38, 0.0  ;;  %v834_v38 = vld [vmem:[%s4676_s15 + $0x180] sm:$0xff] }
  0x8a   : > { %1171 = vadd.xlane.f32.xlu1 %v1170_v41  ;;  %v4070_v41 = vld [vmem:[%s4674_s14 + $0x20] ss:$16 sps:$4 sm:$0xff]  }
  0x8b   : > { %1168 = vadd.xlane.f32.xlu0 %v1167_v42  ;;  %v4071_v42 = vld [vmem:[%s4674_s14 + $0x28] ss:$16 sps:$4 sm:$0xff]   ;;  %3133 = vmatpush1.bf16.msra.mxu0 %v4070_v41  ;;  %v4118_v41 = vld [vmem:[%s4674_s14 + $0x120] ss:$16 sps:$4 sm:$0xff]  }
  0x8c   : > { %3215 = vmatpush1.bf16.msra.mxu1 %v4071_v42  ;;  %3134 = vmatprep.subr.bf16.mxu0 %v4072_v47  ;;  %v4119_v42 = vld [vmem:[%s4674_s14 + $0x128] ss:$16 sps:$4 sm:$0xff]   ;;  %v4120_v47 = vld [vmem:[%s4674_s14 + $0x144] ss:$16 sps:$4 sm:$0xff]  }
  0x8d   : > { %3216 = vmatprep.subr.bf16.mxu1 %v4074_v48  ;;  %v4122_v48 = vld [vmem:[%s4674_s14 + $0x14c] ss:$16 sps:$4 sm:$0xff]  }
  0x8e   : > { %931 = vadd.xlane.f32.xlu1 %v930_v45  ;;  %v879_v45 = vld [vmem:[%s4676_s15 + $0x2e8] sm:$0xff] }
  0x8f   : > { %928 = vadd.xlane.f32.xlu0 %v927_v46  ;;  %v878_v46 = vld [vmem:[%s4676_s15 + $0x2e0] sm:$0xff]  ;;  %v1194_v51 = vsel %vm914_vm0, %v879_v45, 0.0  ;;  %v899_v45 = vld [vmem:[%s4676_s15 + $0x388] sm:$0xff] }
  0x90   : > { %v1191_v52 = vsel %vm914_vm0, %v878_v46, 0.0  ;;  %v898_v46 = vld [vmem:[%s4676_s15 + $0x380] sm:$0xff] }
  0x92   : > { %1123 = vadd.xlane.f32.xlu1 %v1122_v49  ;;  %v4076_v49 = vld [vmem:[%s4674_s14 + $0x40] ss:$16 sps:$4 sm:$0xff]  }
  0x93   : > { %1120 = vadd.xlane.f32.xlu0 %v1119_v50  ;;  %v4077_v50 = vld [vmem:[%s4674_s14 + $0x48] ss:$16 sps:$4 sm:$0xff]   ;;  %3135 = vmatpush1.bf16.msra.mxu0 %v4076_v49  ;;  %v4124_v49 = vld [vmem:[%s4674_s14 + $0x140] ss:$16 sps:$4 sm:$0xff]  }
  0x94   : > { %3217 = vmatpush1.bf16.msra.mxu1 %v4077_v50  ;;  %3136 = vmatprep.subr.bf16.mxu0 %v4078_v55  ;;  %v4125_v50 = vld [vmem:[%s4674_s14 + $0x148] ss:$16 sps:$4 sm:$0xff]   ;;  %v4126_v55 = vld [vmem:[%s4674_s14 + $0x164] ss:$16 sps:$4 sm:$0xff]  }
  0x95   : > { %3218 = vmatprep.subr.bf16.mxu1 %v4080_v56  ;;  %v4128_v56 = vld [vmem:[%s4674_s14 + $0x16c] ss:$16 sps:$4 sm:$0xff]  }
  0x96   : > { %985 = vadd.xlane.f32.xlu1 %v984_v53  ;;  %v799_v53 = vld [vmem:[%s4676_s15 + $0x68] sm:$0xff] }
  0x97   : > { %982 = vadd.xlane.f32.xlu0 %v981_v54  ;;  %v798_v54 = vld [vmem:[%s4676_s15 + $0x60] sm:$0xff]  ;;  %v954_v59 = vsel %vm914_vm0, %v799_v53, 0.0  ;;  %v819_v53 = vld [vmem:[%s4676_s15 + $0x108] sm:$0xff] }
  0x98   : > { %v951_v60 = vsel %vm914_vm0, %v798_v54, 0.0  ;;  %v818_v54 = vld [vmem:[%s4676_s15 + $0x100] sm:$0xff] }
  0x9a   : > { %1177 = vadd.xlane.f32.xlu1 %v1176_v57  ;;  %v4082_v57 = vld [vmem:[%s4674_s14 + $0x60] ss:$16 sps:$4 sm:$0xff]  }
  0x9b   : > { %1174 = vadd.xlane.f32.xlu0 %v1173_v58  ;;  %v4083_v58 = vld [vmem:[%s4674_s14 + $0x68] ss:$16 sps:$4 sm:$0xff]   ;;  %3137 = vmatpush1.bf16.msra.mxu0 %v4082_v57  ;;  %v4130_v57 = vld [vmem:[%s4674_s14 + $0x160] ss:$16 sps:$4 sm:$0xff]  }
  0x9c   : > { %3219 = vmatpush1.bf16.msra.mxu1 %v4083_v58  ;;  %3138 = vmatprep.subr.bf16.mxu0 %v4084_v63  ;;  %v4131_v58 = vld [vmem:[%s4674_s14 + $0x168] ss:$16 sps:$4 sm:$0xff]   ;;  %v4132_v63 = vld [vmem:[%s4674_s14 + $0x184] ss:$16 sps:$4 sm:$0xff]  }
  0x9d   : > { %3220 = vmatprep.subr.bf16.mxu1 %v4086_v0  ;;  %v4134_v0 = vld [vmem:[%s4674_s14 + $0x18c] ss:$16 sps:$4 sm:$0xff]  }
  0x9e   : > { %937 = vadd.xlane.f32.xlu1 %v936_v61  ;;  %v863_v61 = vld [vmem:[%s4676_s15 + $0x268] sm:$0xff] }
  0x9f   : > { %934 = vadd.xlane.f32.xlu0 %v933_v62  ;;  %v862_v62 = vld [vmem:[%s4676_s15 + $0x260] sm:$0xff]  ;;  %v1146_v3 = vsel %vm914_vm0, %v863_v61, 0.0  ;;  %v837_v61 = vld [vmem:[%s4676_s15 + $0x198] sm:$0xff] }
  0xa0   : > { %v1143_v4 = vsel %vm914_vm0, %v862_v62, 0.0  ;;  %v836_v62 = vld [vmem:[%s4676_s15 + $0x190] sm:$0xff] }
  0xa2   : > { %1129 = vadd.xlane.f32.xlu1 %v1128_v1  ;;  %v4088_v1 = vld [vmem:[%s4674_s14 + $0x80] ss:$16 sps:$4 sm:$0xff]  }
  0xa3   : > { %1126 = vadd.xlane.f32.xlu0 %v1125_v2  ;;  %v4089_v2 = vld [vmem:[%s4674_s14 + $0x88] ss:$16 sps:$4 sm:$0xff]   ;;  %3139 = vmatpush1.bf16.msra.mxu0 %v4088_v1  ;;  %v4136_v1 = vld [vmem:[%s4674_s14 + $0x180] ss:$16 sps:$4 sm:$0xff]  }
  0xa4   : > { %3221 = vmatpush1.bf16.msra.mxu1 %v4089_v2  ;;  %3140 = vmatprep.subr.bf16.mxu0 %v4090_v7  ;;  %v4137_v2 = vld [vmem:[%s4674_s14 + $0x188] ss:$16 sps:$4 sm:$0xff]   ;;  %v4138_v7 = vld [vmem:[%s4674_s14 + $0x1a4] ss:$16 sps:$4 sm:$0xff]  }
  0xa5   : > { %3222 = vmatprep.subr.bf16.mxu1 %v4092_v8  ;;  %v4140_v8 = vld [vmem:[%s4674_s14 + $0x1ac] ss:$16 sps:$4 sm:$0xff]  }
  0xa6   : > { %991 = vadd.xlane.f32.xlu1 %v990_v5  ;;  %v817_v5 = vld [vmem:[%s4676_s15 + $0xf8] sm:$0xff] }
  0xa7   : > { %988 = vadd.xlane.f32.xlu0 %v987_v6  ;;  %v816_v6 = vld [vmem:[%s4676_s15 + $0xf0] sm:$0xff]  ;;  %v1008_v11 = vsel %vm914_vm0, %v817_v5, 0.0  ;;  %v883_v5 = vld [vmem:[%s4676_s15 + $0x308] sm:$0xff] }
  0xa8   : > { %v1005_v12 = vsel %vm914_vm0, %v816_v6, 0.0  ;;  %v882_v6 = vld [vmem:[%s4676_s15 + $0x300] sm:$0xff] }
  0xaa   : > { %1183 = vadd.xlane.f32.xlu1 %v1182_v9  ;;  %v4094_v9 = vld [vmem:[%s4674_s14 + $0xa0] ss:$16 sps:$4 sm:$0xff]  }
  0xab   : > { %1180 = vadd.xlane.f32.xlu0 %v1179_v10  ;;  %v4095_v10 = vld [vmem:[%s4674_s14 + $0xa8] ss:$16 sps:$4 sm:$0xff]   ;;  %3141 = vmatpush1.bf16.msra.mxu0 %v4094_v9  ;;  %v4142_v9 = vld [vmem:[%s4674_s14 + $0x1a0] ss:$16 sps:$4 sm:$0xff]  }
  0xac   : > { %3223 = vmatpush1.bf16.msra.mxu1 %v4095_v10  ;;  %3142 = vmatprep.subr.bf16.mxu0 %v4096_v15  ;;  %v4143_v10 = vld [vmem:[%s4674_s14 + $0x1a8] ss:$16 sps:$4 sm:$0xff]   ;;  %v1203_v15 = vsel %vm914_vm0, %v882_v6, 0.0 }
  0xad   : > { %3224 = vmatprep.subr.bf16.mxu1 %v4098_v16  ;;  %v901_v16 = vld [vmem:[%s4676_s15 + $0x398] sm:$0xff] }
  0xae   : > { %943 = vadd.xlane.f32.xlu1 %v942_v13  ;;  %v881_v13 = vld [vmem:[%s4676_s15 + $0x2f8] sm:$0xff] }
  0xaf   : > { %940 = vadd.xlane.f32.xlu0 %v939_v14  ;;  %v880_v14 = vld [vmem:[%s4676_s15 + $0x2f0] sm:$0xff] }
  0xb2   : > { %1135 = vadd.xlane.f32.xlu1 %v1134_v17  ;;  %v4100_v17 = vld [vmem:[%s4674_s14 + $0xc0] ss:$16 sps:$4 sm:$0xff]  }
  0xb3   : > { %1132 = vadd.xlane.f32.xlu0 %v1131_v18  ;;  %v4101_v18 = vld [vmem:[%s4674_s14 + $0xc8] ss:$16 sps:$4 sm:$0xff]   ;;  %3143 = vmatpush1.bf16.msra.mxu0 %v4100_v17 }
  0xb4   : > { %3225 = vmatpush1.bf16.msra.mxu1 %v4101_v18  ;;  %v900_v17 = vld [vmem:[%s4676_s15 + $0x390] sm:$0xff]  ;;  %v4144_v18 = vld [vmem:[%s4674_s14 + $0x1c4] ss:$16 sps:$4 sm:$0xff]  }
  0xb6   : > { %997 = vadd.xlane.f32.xlu1 %v996_v19  ;;  %v1200_v19 = vsel %vm914_vm0, %v881_v13, 0.0 }
  0xb7   : > { %994 = vadd.xlane.f32.xlu0 %v993_v20  ;;  %v1197_v20 = vsel %vm914_vm0, %v880_v14, 0.0  ;;  %v1206_v14 = vsel %vm914_vm0, %v883_v5, 0.0 }
  0xba   : > { %1189 = vadd.xlane.f32.xlu1 %v1188_v23  ;;  %v4102_v23 = vld [vmem:[%s4674_s14 + $0xe4] ss:$16 sps:$4 sm:$0xff]  }
  0xbb   : > { %1186 = vadd.xlane.f32.xlu0 %v1185_v24  ;;  %v4104_v24 = vld [vmem:[%s4674_s14 + $0xec] ss:$16 sps:$4 sm:$0xff]   ;;  %3144 = vmatprep.subr.bf16.mxu0 %v4102_v23 }
  0xbc   : > { %3226 = vmatprep.subr.bf16.mxu1 %v4104_v24  ;;  %3145 = vmatpush1.bf16.msra.mxu0 %v4106_v25  ;;  %v1260_v25 = vsel %vm914_vm0, %v901_v16, 0.0 }
  0xbd   : > { %3227 = vmatpush1.bf16.msra.mxu1 %v4107_v26  ;;  %3146 = vmatprep.subr.bf16.mxu0 %v4108_v31  ;;  %v1257_v26 = vsel %vm914_vm0, %v900_v17, 0.0  ;;  %v821_v31 = vld [vmem:[%s4676_s15 + $0x118] sm:$0xff] }
  0xbe   : > { %949 = vadd.xlane.f32.xlu1 %v948_v27  ;;  %v960_v27 = vsel %vm914_vm0, %v801_v21, 0.0  ;;  %3228 = vmatprep.subr.bf16.mxu1 %v4110_v32  ;;  %v4148_v21 = vld [vmem:[%s4674_s14 + $0x1c0] ss:$16 sps:$4 sm:$0xff]   ;;  %v820_v32 = vld [vmem:[%s4676_s15 + $0x110] sm:$0xff] }
  0xbf   : > { %946 = vadd.xlane.f32.xlu0 %v945_v28  ;;  %v957_v28 = vsel %vm914_vm0, %v800_v22, 0.0  ;;  %v4149_v22 = vld [vmem:[%s4674_s14 + $0x1c8] ss:$16 sps:$4 sm:$0xff]  }
  0xc0   : > { %3147 = vmatpush1.bf16.msra.mxu0 %v4112_v33  ;;  %v4150_v33 = vld [vmem:[%s4674_s14 + $0x1e4] ss:$16 sps:$4 sm:$0xff]  }
  0xc1   : > { %3229 = vmatpush1.bf16.msra.mxu1 %v4113_v34  ;;  %3148 = vmatprep.subr.bf16.mxu0 %v4114_v39  ;;  %v4152_v34 = vld [vmem:[%s4674_s14 + $0x1ec] ss:$16 sps:$4 sm:$0xff]   ;;  %v4154_v39 = vld [vmem:[%s4674_s14 + $0x1e0] ss:$16 sps:$4 sm:$0xff]  }
  0xc2   : > { %1141 = vadd.xlane.f32.xlu1 %v1140_v35  ;;  %v1152_v35 = vsel %vm914_vm0, %v865_v29, 0.0  ;;  %3230 = vmatprep.subr.bf16.mxu1 %v4116_v40  ;;  %v4155_v40 = vld [vmem:[%s4674_s14 + $0x1e8] ss:$16 sps:$4 sm:$0xff]  }
  0xc3   : > { %1138 = vadd.xlane.f32.xlu0 %v1137_v36  ;;  %v1149_v36 = vsel %vm914_vm0, %v864_v30, 0.0 }
  0xc4   : > { %3149 = vmatpush1.bf16.msra.mxu0 %v4118_v41 }
  0xc5   : > { %3231 = vmatpush1.bf16.msra.mxu1 %v4119_v42  ;;  %3150 = vmatprep.subr.bf16.mxu0 %v4120_v47 }
  0xc6   : > { %1003 = vadd.xlane.f32.xlu1 %v1002_v43  ;;  %v1062_v43 = vsel %vm914_vm0, %v835_v37, 0.0  ;;  %3232 = vmatprep.subr.bf16.mxu1 %v4122_v48  ;;  %v884_v48 = vld [vmem:[%s4676_s15 + $0x310] sm:$0xff] }
  0xc7   : > { %1000 = vadd.xlane.f32.xlu0 %v999_v44  ;;  %v1059_v44 = vsel %vm914_vm0, %v834_v38, 0.0 }
  0xc8   : > { %3151 = vmatpush1.bf16.msra.mxu0 %v4124_v49 }
  0xc9   : > { %3233 = vmatpush1.bf16.msra.mxu1 %v4125_v50  ;;  %3152 = vmatprep.subr.bf16.mxu0 %v4126_v55 }
  0xca   : > { %1195 = vadd.xlane.f32.xlu1 %v1194_v51  ;;  %v1254_v51 = vsel %vm914_vm0, %v899_v45, 0.0  ;;  %3234 = vmatprep.subr.bf16.mxu1 %v4128_v56  ;;  %v885_v45 = vld [vmem:[%s4676_s15 + $0x318] sm:$0xff] }
  0xcb   : > { %1192 = vadd.xlane.f32.xlu0 %v1191_v52  ;;  %v1251_v52 = vsel %vm914_vm0, %v898_v46, 0.0 }
  0xcc   : > { %3153 = vmatpush1.bf16.msra.mxu0 %v4130_v57 }
  0xcd   : > { %3235 = vmatpush1.bf16.msra.mxu1 %v4131_v58  ;;  %3154 = vmatprep.subr.bf16.mxu0 %v4132_v63  ;;  %v1212_v58 = vsel %vm914_vm0, %v885_v45, 0.0  ;;  %v838_v63 = vld [vmem:[%s4676_s15 + $0x1a0] sm:$0xff] }
  0xce   : > { %955 = vadd.xlane.f32.xlu1 %v954_v59  ;;  %v1014_v59 = vsel %vm914_vm0, %v819_v53, 0.0  ;;  %3236 = vmatprep.subr.bf16.mxu1 %v4134_v0 }
  0xcf   : > { %952 = vadd.xlane.f32.xlu0 %v951_v60  ;;  %v1011_v60 = vsel %vm914_vm0, %v818_v54, 0.0 }
  0xd0   : > { %3155 = vmatpush1.bf16.msra.mxu0 %v4136_v1 }
  0xd1   : > { %3237 = vmatpush1.bf16.msra.mxu1 %v4137_v2  ;;  %3156 = vmatprep.subr.bf16.mxu0 %v4138_v7 }
  0xd2   : > { %1147 = vadd.xlane.f32.xlu1 %v1146_v3  ;;  %v1068_v3 = vsel %vm914_vm0, %v837_v61, 0.0  ;;  %3238 = vmatprep.subr.bf16.mxu1 %v4140_v8  ;;  %v1209_v61 = vsel %vm914_vm0, %v884_v48, 0.0  ;;  %v1071_v8 = vsel %vm914_vm0, %v838_v63, 0.0 }
  0xd3   : > { %1144 = vadd.xlane.f32.xlu0 %v1143_v4  ;;  %v1065_v4 = vsel %vm914_vm0, %v836_v62, 0.0  ;;  %v839_v62 = vld [vmem:[%s4676_s15 + $0x1a8] sm:$0xff] }
  0xd4   : > { %3157 = vmatpush1.bf16.msra.mxu0 %v4142_v9  ;;  %v1074_v7 = vsel %vm914_vm0, %v839_v62, 0.0 }
  0xd5   : > { %3239 = vmatpush1.bf16.msra.mxu1 %v4143_v10  ;;  %3158 = vmatprep.subr.bf16.mxu0 %v4144_v18 }
  0xd6   : > { %1009 = vadd.xlane.f32.xlu1 %v1008_v11  ;;  %v1813_v11 = vlaneseq }
  0xd7   : > { %1006 = vadd.xlane.f32.xlu0 %v1005_v12 }
  0xd8   : > { %3159 = vmatpush1.bf16.msra.mxu0 %v4148_v21 }
  0xd9   : > { %3160 = vmatprep.subr.bf16.mxu0 %v4150_v33 }
  0xda   : > { %1201 = vadd.xlane.f32.xlu1 %v1200_v19  ;;  %v4146_v19 = vld [vmem:[%s4674_s14 + $0x1cc] ss:$16 sps:$4 sm:$0xff]  }
  0xdb   : > { %1198 = vadd.xlane.f32.xlu0 %v1197_v20  ;;  %v4887_v20 = vand.u32 127, %v1813_v11  ;;  %3240 = vmatprep.subr.bf16.mxu1 %v4146_v19 }
  0xdc   : > { %3241 = vmatpush1.bf16.msra.mxu1 %v4149_v22  ;;  %3161 = vmatpush1.bf16.msra.mxu0 %v4154_v39 }
  0xdd   : > { %3242 = vmatprep.subr.bf16.mxu1 %v4152_v34 }
  0xde   : > { %961 = vadd.xlane.f32.xlu1 %v960_v27 }
  0xdf   : > { %958 = vadd.xlane.f32.xlu0 %v957_v28 }
  0xe0   : > { %3243 = vmatpush1.bf16.msra.mxu1 %v4155_v40 }
  0xe2   : > { %1153 = vadd.xlane.f32.xlu1 %v1152_v35  ;;  %v4897_v35 = vshrl.u32 %v1813_v11, 7 }
  0xe3   : > { %1150 = vadd.xlane.f32.xlu0 %v1149_v36  ;;  %v1819_v36 = vadd.s32 4294967288, %v4887_v20 }
  0xe4   : > { %v4910_v49 = vsub.s32 %v4887_v20, %v4897_v35 }
  0xe5   : > { %v4913_v50 = vsub.s32 %v1819_v36, %v4897_v35 }
  0xe6   : > { %1063 = vadd.xlane.f32.xlu1 %v1062_v43  ;;  %v1020_v43 = vsel %vm914_vm0, %v821_v31, 0.0  ;;  %v822_v31 = vld [vmem:[%s4676_s15 + $0x120] sm:$0xff] }
  0xe7   : > { %1060 = vadd.xlane.f32.xlu0 %v1059_v44  ;;  %v1017_v44 = vsel %vm914_vm0, %v820_v32, 0.0  ;;  %v1023_v45 = vsel %vm914_vm0, %v822_v31, 0.0 }
  0xea   : > { %1255 = vadd.xlane.f32.xlu1 %v1254_v51  ;;  %v1826_v51 = vadd.s32 4294967280, %v4887_v20 }
  0xeb   : > { %1252 = vadd.xlane.f32.xlu0 %v1251_v52  ;;  %v1833_v52 = vadd.s32 4294967272, %v4887_v20 }
  0xec   : > { %v4924_v0 = vsub.s32 %v1826_v51, %v4897_v35 }
  0xed   : > { %v4927_v1 = vsub.s32 %v1833_v52, %v4897_v35 }
  0xee   : > { %1015 = vadd.xlane.f32.xlu1 %v1014_v59 }
  0xef   : > { %1012 = vadd.xlane.f32.xlu0 %v1011_v60 }
  0xf2   : > { %1069 = vadd.xlane.f32.xlu1 %v1068_v3 }
  0xf3   : > { %1066 = vadd.xlane.f32.xlu0 %v1065_v4  ;;  %v1157_v12 = vpop.xlane.xlu1 %1156 }
  0xf4   : > { %v965_v13 = vpop.xlane.xlu0 %964  ;;  %v1380_v27 = vmul.f32 0.0625, %v1157_v12 }
  0xf5   : > { %v1316_v28 = vmul.f32 0.0625, %v965_v13  ;;  %v903_v13 = vld [vmem:[%s4676_s15 + $0x3a8] sm:$0xff] }
  0xf6   : > { %1207 = vadd.xlane.f32.xlu1 %v1206_v14 }
  0xf7   : > { %1204 = vadd.xlane.f32.xlu0 %v1203_v15  ;;  %v1160_v23 = vpop.xlane.xlu1 %1159  ;;  %v902_v15 = vld [vmem:[%s4676_s15 + $0x3a0] sm:$0xff] }
  0xf8   : > { %v968_v24 = vpop.xlane.xlu0 %967  ;;  %v1381_v29 = vmul.f32 0.0625, %v1160_v23 }
  0xf9   : > { %v1317_v30 = vmul.f32 0.0625, %v968_v24  ;;  %v1266_v24 = vsel %vm914_vm0, %v903_v13, 0.0 }
  0xfa   : > { %v4900_v37 = vpack.c.bf16 %v1381_v29, %v1380_v27  ;;  %1261 = vadd.xlane.f32.xlu1 %v1260_v25  ;;  %v1263_v27 = vsel %vm914_vm0, %v902_v15, 0.0 }
  0xfb   : > { %v1437_v38 = vpack.c.bf16 %v1317_v30, %v1316_v28  ;;  %1258 = vadd.xlane.f32.xlu0 %v1257_v26  ;;  %v920_v41 = vpop.xlane.xlu1 %919  ;;  %v823_v28 = vld [vmem:[%s4676_s15 + $0x128] sm:$0xff] }
  0xfc   : > { %v917_v42 = vpop.xlane.xlu0 %916  ;;  %v1301_v46 = vmul.f32 0.0625, %v920_v41  ;;  %v1765_v14 = vunpack.c.l.b16 %v4900_v37  ;;  %v1766_v16 = vunpack.c.h.b16 %v4900_v37  ;;  %v887_v37 = vld [vmem:[%s4676_s15 + $0x328] sm:$0xff] }
  0xfd   : > { %v1300_v47 = vmul.f32 0.0625, %v917_v42  ;;  %v1701_v53 = vunpack.c.l.b16 %v1437_v38  ;;  %v1702_v54 = vunpack.c.h.b16 %v1437_v38  ;;  %v886_v38 = vld [vmem:[%s4676_s15 + $0x320] sm:$0xff]  ;;  %v1026_v42 = vsel %vm914_vm0, %v823_v28, 0.0  ;;  %v904_v28 = vld [vmem:[%s4676_s15 + $0x3b0] sm:$0xff] }
  0xfe   : > { %1021 = vadd.xlane.f32.xlu1 %v1020_v43  ;;  %v2243_v32 = vrot.slane %v1765_v14, %v4910_v49  ;;  %v2247_v33 = vrot.slane %v1766_v16, %v4913_v50  ;;  %v1218_v48 = vsel %vm914_vm0, %v887_v37, 0.0  ;;  %v1215_v51 = vsel %vm914_vm0, %v886_v38, 0.0 }
  0xff   : > { %v4917_v55 = vpack.c.bf16 %v1301_v46, %v1300_v47  ;;  %1018 = vadd.xlane.f32.xlu0 %v1017_v44  ;;  %v974_v56 = vpop.xlane.xlu1 %973  ;;  %v1927_v3 = vrot.slane %v1701_v53, %v4910_v49  ;;  %v1931_v4 = vrot.slane %v1702_v54, %v4913_v50 }
 0x100   : > { %v971_v57 = vpop.xlane.xlu0 %970  ;;  %v1319_v59 = vmul.f32 0.0625, %v974_v56  ;;  %v2248_v52 = vsel %vm1824_vm1, %v2247_v33, %v2243_v32  ;;  %v841_v56 = vld [vmem:[%s4676_s15 + $0x1b8] sm:$0xff] }
 0x101   : > { %v1318_v60 = vmul.f32 0.0625, %v971_v57  ;;  %v1932_v21 = vsel %vm1824_vm1, %v1931_v4, %v1927_v3  ;;  %v1685_v34 = vunpack.c.l.b16 %v4917_v55  ;;  %v1686_v36 = vunpack.c.h.b16 %v4917_v55  ;;  %v840_v57 = vld [vmem:[%s4676_s15 + $0x1b0] sm:$0xff] }
 0x102   : > { %1213 = vadd.xlane.f32.xlu1 %v1212_v58 }
 0x103   : > { %v1438_v2 = vpack.c.bf16 %v1319_v59, %v1318_v60  ;;  %1210 = vadd.xlane.f32.xlu0 %v1209_v61  ;;  %v1112_v5 = vpop.xlane.xlu1 %1111  ;;  %v1818_v53 = vrot.slane %v1685_v34, %v4910_v49  ;;  %v1823_v54 = vrot.slane %v1686_v36, %v4913_v50 }
 0x104   : > { %v1109_v6 = vpop.xlane.xlu0 %1108  ;;  %v1365_v11 = vmul.f32 0.0625, %v1112_v5 }
 0x105   : > { %v1703_v9 = vunpack.c.l.b16 %v1438_v2  ;;  %v1704_v10 = vunpack.c.h.b16 %v1438_v2  ;;  %v1364_v12 = vmul.f32 0.0625, %v1109_v6  ;;  %v1825_v14 = vsel %vm1824_vm1, %v1823_v54, %v1818_v53 }
 0x106   : > { %1075 = vadd.xlane.f32.xlu1 %v1074_v7  ;;  %v1840_v7 = vadd.s32 4294967264, %v4887_v20 }
 0x107   : > { %v1936_v17 = vrot.slane %v1703_v9, %v4924_v0  ;;  %v1941_v18 = vrot.slane %v1704_v10, %v4927_v1  ;;  %v4939_v19 = vpack.c.bf16 %v1365_v11, %v1364_v12  ;;  %1072 = vadd.xlane.f32.xlu0 %v1071_v8  ;;  %v1166_v22 = vpop.xlane.xlu1 %1165  ;;  %v1080_v8 = vsel %vm914_vm0, %v841_v56, 0.0 }
 0x108   : > { %v1163_v23 = vpop.xlane.xlu0 %1162  ;;  %v1383_v26 = vmul.f32 0.0625, %v1166_v22  ;;  %v1077_v9 = vsel %vm914_vm0, %v840_v57, 0.0  ;;  %v4991_v32 = vsub.s32 %v1840_v7, %v4897_v35 }
 0x109   : > { %v1937_v25 = vsel %vm1831_vm2, %v1936_v17, %v1932_v21  ;;  %v1382_v30 = vmul.f32 0.0625, %v1163_v23  ;;  %v1749_v58 = vunpack.c.l.b16 %v4939_v19  ;;  %v1750_v59 = vunpack.c.h.b16 %v4939_v19 }
 0x10a   : > { %v4947_v29 = vsel %vm1838_vm3, %v1941_v18, %v1937_v25  ;;  %1267 = vadd.xlane.f32.xlu1 %v1266_v24  ;;  %v1847_v18 = vadd.s32 4294967256, %v4887_v20  ;;  %v905_v25 = vld [vmem:[%s4676_s15 + $0x3b8] sm:$0xff] }
 0x10b   : > { %v1470_v39 = vpack.c.bf16 %v1383_v26, %v1382_v30  ;;  %1264 = vadd.xlane.f32.xlu0 %v1263_v27  ;;  %v926_v40 = vpop.xlane.xlu1 %925  ;;  %v2164_v15 = vrot.slane %v1749_v58, %v4910_v49  ;;  %v2168_v16 = vrot.slane %v1750_v59, %v4913_v50 }
 0x10c   : > { %v923_v41 = vpop.xlane.xlu0 %922  ;;  %v1303_v43 = vmul.f32 0.0625, %v926_v40  ;;  %v4995_v34 = vsub.s32 %v1847_v18, %v4897_v35  ;;  %v842_v18 = vld [vmem:[%s4676_s15 + $0x1c0] sm:$0xff] }
 0x10d   : > { %v1302_v44 = vmul.f32 0.0625, %v923_v41  ;;  %v1767_v46 = vunpack.c.l.b16 %v1470_v39  ;;  %v1768_v47 = vunpack.c.h.b16 %v1470_v39  ;;  %v2169_v33 = vsel %vm1824_vm1, %v2168_v16, %v2164_v15  ;;  %v843_v15 = vld [vmem:[%s4676_s15 + $0x1c8] sm:$0xff] }
 0x10e   : > { %1027 = vadd.xlane.f32.xlu1 %v1026_v42  ;;  %v1272_v39 = vsel %vm914_vm0, %v905_v25, 0.0 }
 0x10f   : > { %v1430_v55 = vpack.c.bf16 %v1303_v43, %v1302_v44  ;;  %v2252_v60 = vrot.slane %v1767_v46, %v4924_v0  ;;  %v2257_v61 = vrot.slane %v1768_v47, %v4927_v1  ;;  %1024 = vadd.xlane.f32.xlu0 %v1023_v45  ;;  %v1118_v62 = vpop.xlane.xlu1 %1117  ;;  %v1269_v43 = vsel %vm914_vm0, %v904_v28, 0.0  ;;  %v825_v44 = vld [vmem:[%s4676_s15 + $0x138] sm:$0xff]  ;;  %v824_v45 = vld [vmem:[%s4676_s15 + $0x130] sm:$0xff]  ;;  %v907_v28 = vld [vmem:[%s4676_s15 + $0x3c8] sm:$0xff] }
 0x110   : > { %v1115_v63 = vpop.xlane.xlu0 %1114  ;;  %v1367_v4 = vmul.f32 0.0625, %v1118_v62  ;;  %v1032_v56 = vsel %vm914_vm0, %v825_v44, 0.0  ;;  %v1029_v57 = vsel %vm914_vm0, %v824_v45, 0.0  ;;  %v889_v62 = vld [vmem:[%s4676_s15 + $0x338] sm:$0xff]  ;;  %v826_v44 = vld [vmem:[%s4676_s15 + $0x140] sm:$0xff] }
 0x111   : > { %v1687_v2 = vunpack.c.l.b16 %v1430_v55  ;;  %v1688_v3 = vunpack.c.h.b16 %v1430_v55  ;;  %v1366_v5 = vmul.f32 0.0625, %v1115_v63  ;;  %v2253_v6 = vsel %vm1831_vm2, %v2252_v60, %v2248_v52  ;;  %v888_v63 = vld [vmem:[%s4676_s15 + $0x330] sm:$0xff] }
 0x112   : > { %v4974_v10 = vsel %vm1838_vm3, %v2257_v61, %v2253_v6  ;;  %1219 = vadd.xlane.f32.xlu1 %v1218_v48 }
 0x113   : > { %v1830_v11 = vrot.slane %v1687_v2, %v4924_v0  ;;  %v1837_v12 = vrot.slane %v1688_v3, %v4927_v1  ;;  %v1462_v13 = vpack.c.bf16 %v1367_v4, %v1366_v5  ;;  %1216 = vadd.xlane.f32.xlu0 %v1215_v51  ;;  %v980_v17 = vpop.xlane.xlu1 %979 }
 0x114   : > { %v977_v19 = vpop.xlane.xlu0 %976  ;;  %v1321_v24 = vmul.f32 0.0625, %v980_v17 }
 0x115   : > { %v1832_v21 = vsel %vm1831_vm2, %v1830_v11, %v1825_v14  ;;  %v1751_v22 = vunpack.c.l.b16 %v1462_v13  ;;  %v1752_v23 = vunpack.c.h.b16 %v1462_v13  ;;  %v1320_v27 = vmul.f32 0.0625, %v977_v19 }
 0x116   : > { %v4985_v26 = vsel %vm1838_vm3, %v1837_v12, %v1832_v21  ;;  %1081 = vadd.xlane.f32.xlu1 %v1080_v8  ;;  %v1221_v11 = vsel %vm914_vm0, %v888_v63, 0.0 }
 0x117   : > { %v2173_v30 = vrot.slane %v1751_v22, %v4924_v0  ;;  %v2178_v31 = vrot.slane %v1752_v23, %v4927_v1  ;;  %v1439_v36 = vpack.c.bf16 %v1321_v24, %v1320_v27  ;;  %1078 = vadd.xlane.f32.xlu0 %v1077_v9  ;;  %v1172_v37 = vpop.xlane.xlu1 %1171  ;;  %v1224_v9 = vsel %vm914_vm0, %v889_v62, 0.0 }
 0x118   : > { %v1169_v38 = vpop.xlane.xlu0 %1168  ;;  %v1385_v41 = vmul.f32 0.0625, %v1172_v37  ;;  %v1086_v24 = vsel %vm914_vm0, %v843_v15, 0.0  ;;  %v1083_v27 = vsel %vm914_vm0, %v842_v18, 0.0  ;;  %v893_v15 = vld [vmem:[%s4676_s15 + $0x358] sm:$0xff] }
 0x119   : > { %v2174_v40 = vsel %vm1831_vm2, %v2173_v30, %v2169_v33  ;;  %v1384_v42 = vmul.f32 0.0625, %v1169_v38  ;;  %v1705_v47 = vunpack.c.l.b16 %v1439_v36  ;;  %v1706_v48 = vunpack.c.h.b16 %v1439_v36  ;;  %v906_v36 = vld [vmem:[%s4676_s15 + $0x3c0] sm:$0xff]  ;;  %v4158_v18 = vld [vmem:[%s4674_s14 + $0x204] ss:$16 sps:$4 sm:$0xff]  }
 0x11a   : > { %v5003_v46 = vsel %vm1838_vm3, %v2178_v31, %v2174_v40  ;;  %1273 = vadd.xlane.f32.xlu1 %v1272_v39  ;;  %v1278_v40 = vsel %vm914_vm0, %v907_v28, 0.0  ;;  %3171 = vmatprep.subr.bf16.mxu0 %v4158_v18 }
 0x11b   : > { %v1471_v51 = vpack.c.bf16 %v1385_v41, %v1384_v42  ;;  %v1946_v52 = vrot.slane %v1705_v47, %v4991_v32  ;;  %v1951_v53 = vrot.slane %v1706_v48, %v4995_v34  ;;  %1270 = vadd.xlane.f32.xlu0 %v1269_v43  ;;  %v932_v54 = vpop.xlane.xlu1 %931  ;;  %v1275_v41 = vsel %vm914_vm0, %v906_v36, 0.0  ;;  %v827_v42 = vld [vmem:[%s4676_s15 + $0x148] sm:$0xff] }
 0x11c   : > { %v929_v55 = vpop.xlane.xlu0 %928  ;;  %v1305_v60 = vmul.f32 0.0625, %v932_v54  ;;  %v890_v54 = vld [vmem:[%s4676_s15 + $0x340] sm:$0xff] }
 0x11d   : > { %v1769_v58 = vunpack.c.l.b16 %v1471_v51  ;;  %v1770_v59 = vunpack.c.h.b16 %v1471_v51  ;;  %v1304_v61 = vmul.f32 0.0625, %v929_v55  ;;  %v1947_v2 = vsel %vm1845_vm4, %v1946_v52, %v4947_v29 }
 0x11e   : > { %v5014_v3 = vsel %vm1852_vm5, %v1951_v53, %v1947_v2  ;;  %1033 = vadd.xlane.f32.xlu1 %v1032_v56  ;;  %v1038_v51 = vsel %vm914_vm0, %v827_v42, 0.0  ;;  %v1035_v52 = vsel %vm914_vm0, %v826_v44, 0.0  ;;  %v891_v53 = vld [vmem:[%s4676_s15 + $0x348] sm:$0xff]  ;;  %v909_v2 = vld [vmem:[%s4676_s15 + $0x3d8] sm:$0xff]  ;;  %v910_v44 = vld [vmem:[%s4676_s15 + $0x3e0] sm:$0xff] }
 0x11f   : > { %v2262_v4 = vrot.slane %v1769_v58, %v4991_v32  ;;  %v2267_v5 = vrot.slane %v1770_v59, %v4995_v34  ;;  %v1431_v6 = vpack.c.bf16 %v1305_v60, %v1304_v61  ;;  %1030 = vadd.xlane.f32.xlu0 %v1029_v57  ;;  %v1124_v7 = vpop.xlane.xlu1 %1123  ;;  %v1230_v56 = vsel %vm914_vm0, %v891_v53, 0.0  ;;  %v845_v58 = vld [vmem:[%s4676_s15 + $0x1d8] sm:$0xff]  ;;  %v844_v59 = vld [vmem:[%s4676_s15 + $0x1d0] sm:$0xff] }
 0x120   : > { %v1121_v8 = vpop.xlane.xlu0 %1120  ;;  %v1369_v14 = vmul.f32 0.0625, %v1124_v7  ;;  %v1227_v57 = vsel %vm914_vm0, %v890_v54, 0.0  ;;  %v1092_v62 = vsel %vm914_vm0, %v845_v58, 0.0  ;;  %v1089_v63 = vsel %vm914_vm0, %v844_v59, 0.0 }
 0x121   : > { %v2263_v29 = vsel %vm1845_vm4, %v2262_v4, %v4974_v10  ;;  %v1689_v12 = vunpack.c.l.b16 %v1431_v6  ;;  %v1690_v13 = vunpack.c.h.b16 %v1431_v6  ;;  %v1368_v17 = vmul.f32 0.0625, %v1121_v8  ;;  %v908_v4 = vld [vmem:[%s4676_s15 + $0x3d0] sm:$0xff] }
 0x122   : > { %v5024_v16 = vsel %vm1852_vm5, %v2267_v5, %v2263_v29  ;;  %1225 = vadd.xlane.f32.xlu1 %v1224_v9  ;;  %v1284_v7 = vsel %vm914_vm0, %v909_v2, 0.0  ;;  %v1281_v8 = vsel %vm914_vm0, %v908_v4, 0.0  ;;  %v829_v9 = vld [vmem:[%s4676_s15 + $0x158] sm:$0xff]  ;;  %v830_v2 = vld [vmem:[%s4676_s15 + $0x160] sm:$0xff]  ;;  %v895_v4 = vld [vmem:[%s4676_s15 + $0x368] sm:$0xff] }
 0x123   : > { %v1844_v19 = vrot.slane %v1689_v12, %v4991_v32  ;;  %v1851_v21 = vrot.slane %v1690_v13, %v4995_v34  ;;  %v1463_v22 = vpack.c.bf16 %v1369_v14, %v1368_v17  ;;  %1222 = vadd.xlane.f32.xlu0 %v1221_v11  ;;  %v5029_v23 = vpop.xlane.xlu1 %985  ;;  %v828_v11 = vld [vmem:[%s4676_s15 + $0x150] sm:$0xff]  ;;  %v1044_v13 = vsel %vm914_vm0, %v829_v9, 0.0 }
 0x124   : > { %v5031_v10 = vpop.xlane.xlu0 %982  ;;  %v1041_v14 = vsel %vm914_vm0, %v828_v11, 0.0  ;;  %v892_v17 = vld [vmem:[%s4676_s15 + $0x350] sm:$0xff] }
 0x125   : > { %v1846_v25 = vsel %vm1845_vm4, %v1844_v19, %v4985_v26  ;;  %v1753_v31 = vunpack.c.l.b16 %v1463_v22  ;;  %v1754_v33 = vunpack.c.h.b16 %v1463_v22  ;;  %v4161_v19 = vld [vmem:[%s4674_s14 + $0x20c] ss:$16 sps:$4 sm:$0xff]   ;;  %v1854_v22 = vadd.s32 4294967248, %v4887_v20 }
 0x126   : > { %v5039_v30 = vsel %vm1852_vm5, %v1851_v21, %v1846_v25  ;;  %1087 = vadd.xlane.f32.xlu1 %v1086_v24  ;;  %v1323_v21 = vmul.f32 0.0625, %v5029_v23  ;;  %v1322_v24 = vmul.f32 0.0625, %v5031_v10  ;;  %v1861_v25 = vadd.s32 4294967240, %v4887_v20  ;;  %v847_v10 = vld [vmem:[%s4676_s15 + $0x1e8] sm:$0xff]  ;;  %3253 = vmatprep.subr.bf16.mxu1 %v4161_v19 }
 0x127   : > { %v2183_v37 = vrot.slane %v1753_v31, %v4991_v32  ;;  %v2188_v38 = vrot.slane %v1754_v33, %v4995_v34  ;;  %1084 = vadd.xlane.f32.xlu0 %v1083_v27  ;;  %v5044_v39 = vpop.xlane.xlu1 %1177  ;;  %v1868_v27 = vadd.s32 4294967232, %v4887_v20  ;;  %v1236_v33 = vsel %vm914_vm0, %v893_v15, 0.0 }
 0x128   : > { %v5046_v26 = vpop.xlane.xlu0 %1174  ;;  %v1875_v23 = vadd.s32 4294967224, %v4887_v20  ;;  %v1233_v36 = vsel %vm914_vm0, %v892_v17, 0.0  ;;  %v5118_v42 = vpack.c.bf16 %v1323_v21, %v1322_v24  ;;  %v1387_v58 = vmul.f32 0.0625, %v5044_v39  ;;  %v849_v17 = vld [vmem:[%s4676_s15 + $0x1f8] sm:$0xff] }
 0x129   : > { %v2184_v43 = vsel %vm1845_vm4, %v2183_v37, %v5003_v46  ;;  %v1882_v37 = vadd.s32 4294967216, %v4887_v20  ;;  %v1386_v59 = vmul.f32 0.0625, %v5046_v26  ;;  %v1287_v39 = vsel %vm914_vm0, %v910_v44, 0.0  ;;  %v894_v26 = vld [vmem:[%s4676_s15 + $0x360] sm:$0xff] }
 0x12a   : > { %v5055_v45 = vsel %vm1852_vm5, %v2188_v38, %v2184_v43  ;;  %1279 = vadd.xlane.f32.xlu1 %v1278_v40  ;;  %v1889_v38 = vadd.s32 4294967208, %v4887_v20  ;;  %v846_v40 = vld [vmem:[%s4676_s15 + $0x1e0] sm:$0xff]  ;;  %v911_v43 = vld [vmem:[%s4676_s15 + $0x3e8] sm:$0xff]  ;;  %v1707_v11 = vunpack.c.l.b16 %v5118_v42  ;;  %v1903_v15 = vadd.s32 4294967192, %v4887_v20 }
 0x12b   : > { %1276 = vadd.xlane.f32.xlu0 %v1275_v41  ;;  %v5057_v47 = vpop.xlane.xlu1 %937  ;;  %v5116_v41 = vsub.s32 %v1854_v22, %v4897_v35  ;;  %v1290_v9 = vsel %vm914_vm0, %v911_v43, 0.0  ;;  %v1047_v24 = vsel %vm914_vm0, %v830_v2, 0.0  ;;  %v5175_v44 = vsel %vm914_vm0, %v849_v17, 0.0 }
 0x12c   : > { %v5059_v48 = vpop.xlane.xlu0 %934  ;;  %v1307_v18 = vmul.f32 0.0625, %v5057_v47  ;;  %v913_v47 = vld [vmem:[%s4676_s15 + $0x3f8] sm:$0xff] }
 0x12d   : > { %v1306_v19 = vmul.f32 0.0625, %v5059_v48  ;;  %v833_v48 = vld [vmem:[%s4676_s15 + $0x178] sm:$0xff] }
 0x12e   : > { %1039 = vadd.xlane.f32.xlu1 %v1038_v51  ;;  %v5123_v51 = vsub.s32 %v1861_v25, %v4897_v35  ;;  %v1242_v25 = vsel %vm914_vm0, %v895_v4, 0.0 }
 0x12f   : > { %1036 = vadd.xlane.f32.xlu0 %v1035_v52  ;;  %v5065_v46 = vpop.xlane.xlu1 %1129  ;;  %v5126_v52 = vsub.s32 %v1868_v27, %v4897_v35  ;;  %v848_v27 = vld [vmem:[%s4676_s15 + $0x1f0] sm:$0xff] }
 0x130   : > { %v5067_v55 = vpop.xlane.xlu0 %1126 }
 0x132   : > { %1231 = vadd.xlane.f32.xlu1 %v1230_v56  ;;  %v1098_v56 = vsel %vm914_vm0, %v847_v10, 0.0  ;;  %v1239_v10 = vsel %vm914_vm0, %v894_v26, 0.0  ;;  %v897_v26 = vld [vmem:[%s4676_s15 + $0x378] sm:$0xff] }
 0x133   : > { %1228 = vadd.xlane.f32.xlu0 %v1227_v57  ;;  %v5073_v60 = vpop.xlane.xlu1 %991  ;;  %v831_v57 = vld [vmem:[%s4676_s15 + $0x168] sm:$0xff] }
 0x134   : > { %v5075_v61 = vpop.xlane.xlu0 %988 }
 0x135   : > { %v1324_v43 = vmul.f32 0.0625, %v5075_v61 }
 0x136   : > { %1093 = vadd.xlane.f32.xlu1 %v1092_v62  ;;  %v5137_v62 = vsub.s32 %v1875_v23, %v4897_v35  ;;  %v1371_v23 = vmul.f32 0.0625, %v5065_v46  ;;  %v1956_v46 = vrot.slane %v1707_v11, %v5116_v41  ;;  %v896_v11 = vld [vmem:[%s4676_s15 + $0x370] sm:$0xff] }
 0x137   : > { %1090 = vadd.xlane.f32.xlu0 %v1089_v63  ;;  %v5081_v5 = vpop.xlane.xlu1 %1183  ;;  %v1095_v63 = vsel %vm914_vm0, %v846_v40, 0.0  ;;  %v1325_v40 = vmul.f32 0.0625, %v5073_v60  ;;  %v1432_v60 = vpack.c.bf16 %v1307_v18, %v1306_v19 }
 0x138   : > { %v5083_v6 = vpop.xlane.xlu0 %1180  ;;  %v1389_v18 = vmul.f32 0.0625, %v5081_v5 }
 0x139   : > { %v5202_v17 = vpack.c.bf16 %v1325_v40, %v1324_v43  ;;  %v1388_v19 = vmul.f32 0.0625, %v5083_v6  ;;  %v5218_v6 = vsel %vm914_vm0, %v897_v26, 0.0 }
 0x13a   : > { %1285 = vadd.xlane.f32.xlu1 %v1284_v7  ;;  %v5143_v7 = vsub.s32 %v1882_v37, %v4897_v35  ;;  %v912_v37 = vld [vmem:[%s4676_s15 + $0x3f0] sm:$0xff] }
 0x13b   : > { %1282 = vadd.xlane.f32.xlu0 %v1281_v8  ;;  %v5089_v29 = vpop.xlane.xlu1 %943  ;;  %v5146_v8 = vsub.s32 %v1889_v38, %v4897_v35  ;;  %v1708_v38 = vunpack.c.h.b16 %v5118_v42  ;;  %v5185_v42 = vsel %vm914_vm0, %v848_v27, 0.0  ;;  %v1957_v27 = vsel %vm1859_vm6, %v1956_v46, %v5014_v3 }
 0x13c   : > { %v5091_v12 = vpop.xlane.xlu0 %940  ;;  %v5221_v3 = vsel %vm914_vm0, %v896_v11, 0.0  ;;  %v1709_v40 = vunpack.c.l.b16 %v5202_v17  ;;  %v1473_v43 = vpack.c.bf16 %v1389_v18, %v1388_v19 }
 0x13e   : > { %1045 = vadd.xlane.f32.xlu1 %v1044_v13  ;;  %v1050_v13 = vsel %vm914_vm0, %v831_v57, 0.0 }
 0x13f   : > { %1042 = vadd.xlane.f32.xlu0 %v1041_v14  ;;  %v5104_v28 = vpop.xlane.xlu1 %1135  ;;  %v1896_v14 = vadd.s32 4294967200, %v4887_v20 }
 0x140   : > { %v5106_v31 = vpop.xlane.xlu0 %1132  ;;  %v1373_v26 = vmul.f32 0.0625, %v5104_v28 }
 0x142   : > { %1237 = vadd.xlane.f32.xlu1 %v1236_v33  ;;  %v1472_v33 = vpack.c.bf16 %v1387_v58, %v1386_v59  ;;  %v5188_v58 = vsel %vm914_vm0, %v913_v47, 0.0  ;;  %v5191_v59 = vsel %vm914_vm0, %v912_v37, 0.0  ;;  %v1691_v37 = vunpack.c.l.b16 %v1432_v60 }
 0x143   : > { %1234 = vadd.xlane.f32.xlu0 %v1233_v36  ;;  %v5128_v53 = vpop.xlane.xlu1 %997  ;;  %v1370_v36 = vmul.f32 0.0625, %v5067_v55  ;;  %v5179_v55 = vsub.s32 %v1896_v14, %v4897_v35  ;;  %v1910_v14 = vadd.s32 4294967184, %v4887_v20 }
 0x144   : > { %v5130_v54 = vpop.xlane.xlu0 %994  ;;  %v1771_v2 = vunpack.c.l.b16 %v1472_v33  ;;  %v1772_v47 = vunpack.c.h.b16 %v1472_v33  ;;  %v1858_v11 = vrot.slane %v1691_v37, %v5116_v41  ;;  %v1774_v37 = vunpack.c.h.b16 %v1473_v43 }
 0x145   : > { %v1464_v4 = vpack.c.bf16 %v1371_v23, %v1370_v36  ;;  %v1309_v23 = vmul.f32 0.0625, %v5089_v29  ;;  %v1308_v36 = vmul.f32 0.0625, %v5091_v12 }
 0x146   : > { %1099 = vadd.xlane.f32.xlu1 %v1098_v56  ;;  %v5182_v56 = vsub.s32 %v1903_v15, %v4897_v35  ;;  %v1961_v15 = vrot.slane %v1708_v38, %v5123_v51  ;;  %v2272_v29 = vrot.slane %v1771_v2, %v5116_v41  ;;  %v1692_v38 = vunpack.c.h.b16 %v1432_v60 }
 0x147   : > { %1096 = vadd.xlane.f32.xlu0 %v1095_v63  ;;  %v5158_v21 = vpop.xlane.xlu1 %1189  ;;  %v5194_v63 = vsel %vm914_vm0, %v833_v48, 0.0  ;;  %v1755_v12 = vunpack.c.l.b16 %v1464_v4  ;;  %v2277_v46 = vrot.slane %v1772_v47, %v5123_v51  ;;  %v1372_v2 = vmul.f32 0.0625, %v5106_v31 }
 0x148   : > { %v5160_v22 = vpop.xlane.xlu0 %1186  ;;  %v1962_v33 = vsel %vm1866_vm7, %v1961_v15, %v1957_v27  ;;  %v1326_v15 = vmul.f32 0.0625, %v5130_v54  ;;  %v2273_v18 = vsel %vm1859_vm6, %v2272_v29, %v5024_v16  ;;  %v1391_v28 = vmul.f32 0.0625, %v5158_v21 }
 0x149   : > { %v2193_v19 = vrot.slane %v1755_v12, %v5116_v41  ;;  %v1390_v31 = vmul.f32 0.0625, %v5160_v22  ;;  %v1773_v47 = vunpack.c.l.b16 %v1473_v43  ;;  %v1860_v16 = vsel %vm1859_vm6, %v1858_v11, %v5039_v30 }
 0x14a   : > { %1291 = vadd.xlane.f32.xlu1 %v1290_v9  ;;  %v832_v9 = vld [vmem:[%s4676_s15 + $0x170] sm:$0xff] }
 0x14b   : > { %1288 = vadd.xlane.f32.xlu0 %v1287_v39  ;;  %v950_v61 = vpop.xlane.xlu1 %949  ;;  %v1917_v39 = vadd.s32 4294967176, %v4887_v20  ;;  %v5215_v5 = vsel %vm914_vm0, %v832_v9, 0.0  ;;  %v1433_v9 = vpack.c.bf16 %v1309_v23, %v1308_v36  ;;  %v2194_v12 = vsel %vm1859_vm6, %v2193_v19, %v5055_v45 }
 0x14c   : > { %v947_v57 = vpop.xlane.xlu0 %946  ;;  %v1311_v23 = vmul.f32 0.0625, %v950_v61  ;;  %v2282_v30 = vrot.slane %v1773_v47, %v5126_v52  ;;  %vm2477_vm0 = vcmask 1041409  }
 0x14d   : > { %v1693_v54 = vunpack.c.l.b16 %v1433_v9  ;;  %v1310_v36 = vmul.f32 0.0625, %v947_v57 }
 0x14e   : > { %1051 = vadd.xlane.f32.xlu1 %v1050_v13  ;;  %v5225_v13 = vsub.s32 %v1910_v14, %v4897_v35  ;;  %v1756_v14 = vunpack.c.h.b16 %v1464_v4  ;;  %v1710_v4 = vunpack.c.h.b16 %v5202_v17 }
 0x14f   : > { %1048 = vadd.xlane.f32.xlu0 %v1047_v24  ;;  %v5210_v20 = vpop.xlane.xlu1 %1141  ;;  %v5228_v24 = vsub.s32 %v1917_v39, %v4897_v35  ;;  %v1327_v39 = vmul.f32 0.0625, %v5128_v53  ;;  %v1966_v53 = vrot.slane %v1709_v40, %v5126_v52  ;;  %v5258_v11 = vpack.c.bf16 %v1311_v23, %v1310_v36 }
 0x150   : > { %v5212_v48 = vpop.xlane.xlu0 %1138  ;;  %v2198_v21 = vrot.slane %v1756_v14, %v5123_v51  ;;  %v1971_v40 = vrot.slane %v1710_v4, %v5137_v62  ;;  %v1375_v23 = vmul.f32 0.0625, %v5210_v20 }
 0x151   : > { %v1442_v22 = vpack.c.bf16 %v1327_v39, %v1326_v15  ;;  %v1967_v43 = vsel %vm1873_vm8, %v1966_v53, %v1962_v33  ;;  %v1374_v36 = vmul.f32 0.0625, %v5212_v48 }
 0x152   : > { %1243 = vadd.xlane.f32.xlu1 %v1242_v25  ;;  %v1865_v25 = vrot.slane %v1692_v38, %v5123_v51  ;;  %v1474_v38 = vpack.c.bf16 %v1391_v28, %v1390_v31  ;;  %v2199_v14 = vsel %vm1866_vm7, %v2198_v21, %v2194_v12  ;;  %v1972_v19 = vsel %vm1880_vm9, %v1971_v40, %v1967_v43 }
 0x153   : > { %1240 = vadd.xlane.f32.xlu0 %v1239_v10  ;;  %v1004_v60 = vpop.xlane.xlu1 %1003  ;;  %v1465_v10 = vpack.c.bf16 %v1373_v26, %v1372_v2  ;;  %v1694_v26 = vunpack.c.h.b16 %v1433_v9  ;;  %v1711_v39 = vunpack.c.l.b16 %v1442_v22  ;;  %v1712_v53 = vunpack.c.h.b16 %v1442_v22 }
 0x154   : > { %v1001_v27 = vpop.xlane.xlu0 %1000  ;;  %v1329_v61 = vmul.f32 0.0625, %v1004_v60  ;;  %v1867_v45 = vsel %vm1866_vm7, %v1865_v25, %v1860_v16  ;;  %v1775_v33 = vunpack.c.l.b16 %v1474_v38  ;;  %v1466_v40 = vpack.c.bf16 %v1375_v23, %v1374_v36 }
 0x155   : > { %v1328_v57 = vmul.f32 0.0625, %v1001_v27  ;;  %v1757_v2 = vunpack.c.l.b16 %v1465_v10  ;;  %v1879_v28 = vrot.slane %v1694_v26, %v5137_v62  ;;  %v1758_v31 = vunpack.c.h.b16 %v1465_v10 }
 0x156   : > { %1105 = vadd.xlane.f32.xlu1 %v5175_v44  ;;  %v2278_v44 = vsel %vm1866_vm7, %v2277_v46, %v2273_v18  ;;  %v2287_v46 = vrot.slane %v1774_v37, %v5137_v62  ;;  %v1976_v47 = vrot.slane %v1711_v39, %v5143_v7  ;;  %v2292_v37 = vrot.slane %v1775_v33, %v5143_v7 }
 0x157   : > { %1102 = vadd.xlane.f32.xlu0 %v5185_v42  ;;  %v1196_v29 = vpop.xlane.xlu1 %1195  ;;  %v1872_v42 = vrot.slane %v1693_v54, %v5126_v52  ;;  %v1443_v60 = vpack.c.bf16 %v1329_v61, %v1328_v57  ;;  %v2203_v4 = vrot.slane %v1757_v2, %v5126_v52  ;;  %v1776_v54 = vunpack.c.h.b16 %v1474_v38 }
 0x158   : > { %v1193_v17 = vpop.xlane.xlu0 %1192  ;;  %v1393_v27 = vmul.f32 0.0625, %v1196_v29  ;;  %v1981_v48 = vrot.slane %v1712_v53, %v5146_v8  ;;  %v1977_v57 = vsel %vm1887_vm10, %v1976_v47, %v1972_v19 }
 0x159   : > { %v1392_v18 = vmul.f32 0.0625, %v1193_v17  ;;  %v1874_v25 = vsel %vm1873_vm8, %v1872_v42, %v1867_v45  ;;  %v1713_v22 = vunpack.c.l.b16 %v1443_v60  ;;  %v2208_v17 = vrot.slane %v1758_v31, %v5137_v62 }
 0x15a   : > { %1297 = vadd.xlane.f32.xlu1 %v5188_v58  ;;  %v2283_v58 = vsel %vm1873_vm8, %v2282_v30, %v2278_v44  ;;  %v2204_v20 = vsel %vm1873_vm8, %v2203_v4, %v2199_v14  ;;  %v2297_v44 = vrot.slane %v1776_v54, %v5146_v8  ;;  %v1714_v30 = vunpack.c.h.b16 %v1443_v60 }
 0x15b   : > { %1294 = vadd.xlane.f32.xlu0 %v5191_v59  ;;  %v956_v9 = vpop.xlane.xlu1 %955  ;;  %v1695_v59 = vunpack.c.l.b16 %v5258_v11  ;;  %v2288_v21 = vsel %vm1880_vm9, %v2287_v46, %v2283_v58  ;;  %v1475_v29 = vpack.c.bf16 %v1393_v27, %v1392_v18  ;;  %v1986_v2 = vrot.slane %v1713_v22, %v5179_v55 }
 0x15c   : > { %v953_v15 = vpop.xlane.xlu0 %952  ;;  %v1313_v12 = vmul.f32 0.0625, %v956_v9  ;;  %v2293_v42 = vsel %vm1887_vm10, %v2292_v37, %v2288_v21  ;;  %v2209_v9 = vsel %vm1880_vm9, %v2208_v17, %v2204_v20  ;;  %v1759_v60 = vunpack.c.l.b16 %v1466_v40 }
 0x15d   : > { %v1312_v38 = vmul.f32 0.0625, %v953_v15  ;;  %v1886_v61 = vrot.slane %v1695_v59, %v5143_v7  ;;  %v1777_v45 = vunpack.c.l.b16 %v1475_v29  ;;  %v1982_v15 = vsel %vm1894_vm11, %v1981_v48, %v1977_v57 }
 0x15e   : > { %1057 = vadd.xlane.f32.xlu1 %v5194_v63  ;;  %v1881_v63 = vsel %vm1880_vm9, %v1879_v28, %v1874_v25  ;;  %v1991_v27 = vrot.slane %v1714_v30, %v5182_v56  ;;  %v1778_v18 = vunpack.c.h.b16 %v1475_v29  ;;  %v2298_v31 = vsel %vm1894_vm11, %v2297_v44, %v2293_v42 }
 0x15f   : > { %1054 = vadd.xlane.f32.xlu0 %v5215_v5  ;;  %v1148_v10 = vpop.xlane.xlu1 %1147  ;;  %v1696_v5 = vunpack.c.h.b16 %v5258_v11  ;;  %v1435_v14 = vpack.c.bf16 %v1313_v12, %v1312_v38  ;;  %v1888_v33 = vsel %vm1887_vm10, %v1886_v61, %v1881_v63  ;;  %v1987_v53 = vsel %vm1901_vm12, %v1986_v2, %v1982_v15 }
 0x160   : > { %v1145_v16 = vpop.xlane.xlu0 %1144  ;;  %v1377_v46 = vmul.f32 0.0625, %v1148_v10  ;;  %v2302_v59 = vrot.slane %v1777_v45, %v5179_v55  ;;  %v1760_v10 = vunpack.c.h.b16 %v1466_v40  ;;  %v2213_v37 = vrot.slane %v1759_v60, %v5143_v7 }
 0x161   : > { %v1697_v47 = vunpack.c.l.b16 %v1435_v14  ;;  %v2307_v22 = vrot.slane %v1778_v18, %v5182_v56  ;;  %v1992_v12 = vsel %vm1908_vm13, %v1991_v27, %v1987_v53  ;;  %v1698_v61 = vunpack.c.h.b16 %v1435_v14 }
 0x162   : > { %1249 = vadd.xlane.f32.xlu1 %v5218_v6  ;;  %v1376_v6 = vmul.f32 0.0625, %v1145_v16  ;;  %v2303_v40 = vsel %vm1901_vm12, %v2302_v59, %v2298_v31  ;;  %v2214_v2 = vsel %vm1887_vm10, %v2213_v37, %v2209_v9  ;;  %v2218_v45 = vrot.slane %v1760_v10, %v5146_v8 }
 0x163   : > { %1246 = vadd.xlane.f32.xlu0 %v5221_v3  ;;  %v1010_v26 = vpop.xlane.xlu1 %1009  ;;  %v1893_v3 = vrot.slane %v1696_v5, %v5146_v8  ;;  %v1900_v57 = vrot.slane %v1697_v47, %v5179_v55  ;;  %v1907_v27 = vrot.slane %v1698_v61, %v5182_v56 }
 0x164   : > { %v1007_v43 = vpop.xlane.xlu0 %1006  ;;  %v1331_v11 = vmul.f32 0.0625, %v1010_v26  ;;  %v1467_v54 = vpack.c.bf16 %v1377_v46, %v1376_v6 }
 0x165   : > { %v1330_v39 = vmul.f32 0.0625, %v1007_v43  ;;  %v1895_v36 = vsel %vm1894_vm11, %v1893_v3, %v1888_v33  ;;  %v2308_v3 = vsel %vm1908_vm13, %v2307_v22, %v2303_v40 }
 0x166   : > { %v1761_v44 = vunpack.c.l.b16 %v1467_v54  ;;  %v1902_v60 = vsel %vm1901_vm12, %v1900_v57, %v1895_v36 }
 0x167   : > { %v1444_v19 = vpack.c.bf16 %v1331_v11, %v1330_v39  ;;  %v1202_v58 = vpop.xlane.xlu1 %1201  ;;  %v1762_v11 = vunpack.c.h.b16 %v1467_v54  ;;  %v1909_v22 = vsel %vm1908_vm13, %v1907_v27, %v1902_v60 }
 0x168   : > { %v1199_v28 = vpop.xlane.xlu0 %1198  ;;  %v1395_v25 = vmul.f32 0.0625, %v1202_v58  ;;  %v2223_v18 = vrot.slane %v1761_v44, %v5179_v55 }
 0x169   : > { %v1394_v4 = vmul.f32 0.0625, %v1199_v28  ;;  %v1715_v23 = vunpack.c.l.b16 %v1444_v19  ;;  %v1716_v16 = vunpack.c.h.b16 %v1444_v19 }
 0x16b   : > { %v1476_v21 = vpack.c.bf16 %v1395_v25, %v1394_v4  ;;  %v1996_v29 = vrot.slane %v1715_v23, %v5225_v13  ;;  %v962_v63 = vpop.xlane.xlu1 %961  ;;  %v2001_v30 = vrot.slane %v1716_v16, %v5228_v24  ;;  %v2219_v25 = vsel %vm1894_vm11, %v2218_v45, %v2214_v2 }
 0x16c   : > { %v959_v17 = vpop.xlane.xlu0 %958  ;;  %v1315_v48 = vmul.f32 0.0625, %v962_v63  ;;  %v2228_v4 = vrot.slane %v1762_v11, %v5182_v56  ;;  %v4156_v11 = vld [vmem:[%s4674_s14 + $0x200] ss:$16 sps:$4 sm:$0xff]  }
 0x16d   : > { %v1779_v38 = vunpack.c.l.b16 %v1476_v21  ;;  %v1780_v20 = vunpack.c.h.b16 %v1476_v21  ;;  %v1314_v5 = vmul.f32 0.0625, %v959_v17  ;;  %v1997_v14 = vsel %vm1915_vm14, %v1996_v29, %v1992_v12 }
 0x16e   : > { %v2002_v28 = vsel %vm1922_vm15, %v2001_v30, %v1997_v14  ;;  %v2224_v21 = vsel %vm1901_vm12, %v2223_v18, %v2219_v25  ;;  %v4173_v25 = vld [vmem:[%s4674_s14 + $0x24c] ss:$16 sps:$4 sm:$0xff]  }
 0x16f   : > { %v2312_v26 = vrot.slane %v1779_v38, %v5225_v13  ;;  %v2317_v43 = vrot.slane %v1780_v20, %v5228_v24  ;;  %v1436_v42 = vpack.c.bf16 %v1315_v48, %v1314_v5  ;;  %v1154_v46 = vpop.xlane.xlu1 %1153  ;;  %v2229_v57 = vsel %vm1908_vm13, %v2228_v4, %v2224_v21  ;;  %v4168_v21 = vld [vmem:[%s4674_s14 + $0x240] ss:$16 sps:$4 sm:$0xff]  }
 0x170   : > { %v1151_v6 = vpop.xlane.xlu0 %1150  ;;  %v1379_v15 = vmul.f32 0.0625, %v1154_v46  ;;  %v4159_v46 = vld [vmem:[%s4674_s14 + $0x208] ss:$16 sps:$4 sm:$0xff]  }
 0x171   : > { %v1699_v39 = vunpack.c.l.b16 %v1436_v42  ;;  %v1378_v33 = vmul.f32 0.0625, %v1151_v6  ;;  %v2313_v9 = vsel %vm1915_vm14, %v2312_v26, %v2308_v3  ;;  %v1700_v19 = vunpack.c.h.b16 %v1436_v42 }
 0x172   : > { %v2318_v31 = vsel %vm1922_vm15, %v2317_v43, %v2313_v9 }
 0x173   : > { %v1468_v58 = vpack.c.bf16 %v1379_v15, %v1378_v33  ;;  %v1914_v53 = vrot.slane %v1699_v39, %v5225_v13  ;;  %v1064_v59 = vpop.xlane.xlu1 %1063  ;;  %v2479_v54 = vsel %vm2477_vm0, %v2318_v31, %v2002_v28  ;;  %v1921_v29 = vrot.slane %v1700_v19, %v5228_v24  ;;  %v4164_v39 = vld [vmem:[%s4674_s14 + $0x224] ss:$16 sps:$4 sm:$0xff]   ;;  %v4167_v15 = vld [vmem:[%s4674_s14 + $0x22c] ss:$16 sps:$4 sm:$0xff]   ;;  %v4165_v28 = vld [vmem:[%s4674_s14 + $0x228] ss:$16 sps:$4 sm:$0xff]  }
 0x174   : > { %v1061_v47 = vpop.xlane.xlu0 %1060  ;;  %v1349_v10 = vmul.f32 0.0625, %v1064_v59  ;;  %v2483_v37 = vpack.c.b16 %v2479_v54, %v2479_v54  ;;  %v4170_v31 = vld [vmem:[%s4674_s14 + $0x244] ss:$16 sps:$4 sm:$0xff]  }
 0x175   : > { %v1763_v23 = vunpack.c.l.b16 %v1468_v58  ;;  %v1764_v36 = vunpack.c.h.b16 %v1468_v58  ;;  %v1348_v16 = vmul.f32 0.0625, %v1061_v47  ;;  %v1916_v48 = vsel %vm1915_vm14, %v1914_v53, %v1909_v22  ;;  %v4162_v58 = vld [vmem:[%s4674_s14 + $0x220] ss:$16 sps:$4 sm:$0xff]  }
 0x176   : > { %3162 = vmatprep.mubr.bf16.mxu0 %v2483_v37  ;;  %3244 = vmatprep.mubr.bf16.mxu1 %v2483_v37  ;;  %v1923_v30 = vsel %vm1922_vm15, %v1921_v29, %v1916_v48  ;;  %v4171_v37 = vld [vmem:[%s4674_s14 + $0x248] ss:$16 sps:$4 sm:$0xff]   ;;  %v4176_v29 = vld [vmem:[%s4674_s14 + $0x264] ss:$16 sps:$4 sm:$0xff]  }
 0x177   : > { %v2233_v63 = vrot.slane %v1763_v23, %v5225_v13  ;;  %v2238_v17 = vrot.slane %v1764_v36, %v5228_v24  ;;  %v1453_v12 = vpack.c.bf16 %v1349_v10, %v1348_v16  ;;  %v1256_v38 = vpop.xlane.xlu1 %1255 }
 0x178   : > { %v1253_v20 = vpop.xlane.xlu0 %1252  ;;  %v1413_v5 = vmul.f32 0.0625, %v1256_v38 }
 0x179   : > { %v1412_v61 = vmul.f32 0.0625, %v1253_v20  ;;  %v2234_v44 = vsel %vm1915_vm14, %v2233_v63, %v2229_v57  ;;  %v1733_v33 = vunpack.c.l.b16 %v1453_v12  ;;  %v1734_v3 = vunpack.c.h.b16 %v1453_v12  ;;  %v4179_v63 = vld [vmem:[%s4674_s14 + $0x26c] ss:$16 sps:$4 sm:$0xff]  }
 0x17a   : > { %v2239_v26 = vsel %vm1922_vm15, %v2238_v17, %v2234_v44 }
 0x17b   : > { %v5330_v40 = vpack.c.bf16 %v1413_v5, %v1412_v61  ;;  %v1016_v43 = vpop.xlane.xlu1 %1015  ;;  %v2478_v2 = vsel %vm2477_vm0, %v2239_v26, %v1923_v30  ;;  %v2085_v53 = vrot.slane %v1733_v33, %v4910_v49  ;;  %v2089_v59 = vrot.slane %v1734_v3, %v4913_v50  ;;  %v4174_v30 = vld [vmem:[%s4674_s14 + $0x260] ss:$16 sps:$4 sm:$0xff]   ;;  %v4177_v26 = vld [vmem:[%s4674_s14 + $0x268] ss:$16 sps:$4 sm:$0xff]  }
 0x17c   : > { %v1013_v42 = vpop.xlane.xlu0 %1012  ;;  %v1333_v45 = vmul.f32 0.0625, %v1016_v43  ;;  %v2482_v14 = vpack.c.b16 %v2478_v2, %v2478_v2  ;;  %v4185_v2 = vld [vmem:[%s4674_s14 + $0x28c] ss:$16 sps:$4 sm:$0xff]   ;;  %v4180_v3 = vld [vmem:[%s4674_s14 + $0x280] ss:$16 sps:$4 sm:$0xff]  }
 0x17d   : > { %v1332_v6 = vmul.f32 0.0625, %v1013_v42  ;;  %v1797_v22 = vunpack.c.l.b16 %v5330_v40  ;;  %v1798_v17 = vunpack.c.h.b16 %v5330_v40  ;;  %v2090_v48 = vsel %vm1824_vm1, %v2089_v59, %v2085_v53  ;;  %v4182_v42 = vld [vmem:[%s4674_s14 + $0x284] ss:$16 sps:$4 sm:$0xff]  }
 0x17e   : > { %3163 = vmatmul.mubr.bf16.vlgmr.msra.gmra.mrb[0].mxu0 %v2482_v14  ;;  %3245 = vmatmul.mubr.bf16.vlgmr.msra.gmra.mrb[0].mxu1 %v2482_v14 }
 0x17f   : > { %v5339_v60 = vpack.c.bf16 %v1333_v45, %v1332_v6  ;;  %v1070_v27 = vpop.xlane.xlu1 %1069  ;;  %3172 = vmatpush1.bf16.msra.mxu0 %v4156_v11  ;;  %3254 = vmatpush1.bf16.msra.mxu1 %v4159_v46  ;;  %v2401_v45 = vrot.slane %v1797_v22, %v4910_v49  ;;  %v2405_v11 = vrot.slane %v1798_v17, %v4913_v50  ;;  %v4194_v17 = vld [vmem:[%s4674_s14 + $0x2c4] ss:$16 sps:$4 sm:$0xff]  }
 0x180   : > { %v1067_v18 = vpop.xlane.xlu0 %1066  ;;  %v1351_v9 = vmul.f32 0.0625, %v1070_v27  ;;  %3173 = vmatprep.subr.bf16.mxu0 %v4164_v39  ;;  %3255 = vmatprep.subr.bf16.mxu1 %v4167_v15  ;;  %v4183_v27 = vld [vmem:[%s4674_s14 + $0x288] ss:$16 sps:$4 sm:$0xff]  }
 0x181   : > { %v1350_v19 = vmul.f32 0.0625, %v1067_v18  ;;  %v1717_v46 = vunpack.c.l.b16 %v5339_v60  ;;  %v1718_v39 = vunpack.c.h.b16 %v5339_v60 }
 0x183   : > { %v1454_v4 = vpack.c.bf16 %v1351_v9, %v1350_v19  ;;  %v1208_v47 = vpop.xlane.xlu1 %1207  ;;  %3174 = vmatpush1.bf16.msra.mxu0 %v4162_v58  ;;  %3256 = vmatpush1.bf16.msra.mxu1 %v4165_v28  ;;  %v4188_v58 = vld [vmem:[%s4674_s14 + $0x2a4] ss:$16 sps:$4 sm:$0xff]   ;;  %v4191_v28 = vld [vmem:[%s4674_s14 + $0x2ac] ss:$16 sps:$4 sm:$0xff]  }
 0x184   : > { %v1205_v54 = vpop.xlane.xlu0 %1204  ;;  %v1397_v10 = vmul.f32 0.0625, %v1208_v47  ;;  %3175 = vmatprep.subr.bf16.mxu0 %v4170_v31  ;;  %3257 = vmatprep.subr.bf16.mxu1 %v4173_v25  ;;  %v2406_v31 = vsel %vm1824_vm1, %v2405_v11, %v2401_v45  ;;  %v2006_v25 = vrot.slane %v1717_v46, %v4910_v49  ;;  %v2010_v47 = vrot.slane %v1718_v39, %v4913_v50  ;;  %v4203_v39 = vld [vmem:[%s4674_s14 + $0x2ec] ss:$16 sps:$4 sm:$0xff]  }
 0x185   : > { %v1735_v23 = vunpack.c.l.b16 %v1454_v4  ;;  %v1736_v36 = vunpack.c.h.b16 %v1454_v4  ;;  %v1396_v16 = vmul.f32 0.0625, %v1205_v54 }
 0x187   : > { %v2094_v12 = vrot.slane %v1735_v23, %v4924_v0  ;;  %v2099_v38 = vrot.slane %v1736_v36, %v4927_v1  ;;  %v5355_v20 = vpack.c.bf16 %v1397_v10, %v1396_v16  ;;  %v1262_v5 = vpop.xlane.xlu1 %1261  ;;  %3176 = vmatpush1.bf16.msra.mxu0 %v4168_v21  ;;  %3258 = vmatpush1.bf16.msra.mxu1 %v4171_v37  ;;  %v4186_v16 = vld [vmem:[%s4674_s14 + $0x2a0] ss:$16 sps:$4 sm:$0xff]   ;;  %v4189_v21 = vld [vmem:[%s4674_s14 + $0x2a8] ss:$16 sps:$4 sm:$0xff]  }
 0x188   : > { %v1259_v61 = vpop.xlane.xlu0 %1258  ;;  %v1415_v44 = vmul.f32 0.0625, %v1262_v5  ;;  %3177 = vmatprep.subr.bf16.mxu0 %v4176_v29  ;;  %3259 = vmatprep.subr.bf16.mxu1 %v4179_v63 }
 0x189   : > { %v2095_v57 = vsel %vm1831_vm2, %v2094_v12, %v2090_v48  ;;  %v1414_v43 = vmul.f32 0.0625, %v1259_v61  ;;  %v1781_v54 = vunpack.c.l.b16 %v5355_v20  ;;  %v1782_v23 = vunpack.c.h.b16 %v5355_v20  ;;  %v4197_v12 = vld [vmem:[%s4674_s14 + $0x2cc] ss:$16 sps:$4 sm:$0xff]  }
 0x18a   : > { %v5362_v40 = vsel %vm1838_vm3, %v2099_v38, %v2095_v57  ;;  %v2011_v57 = vsel %vm1824_vm1, %v2010_v47, %v2006_v25 }
 0x18b   : > { %v1486_v6 = vpack.c.bf16 %v1415_v44, %v1414_v43  ;;  %v1022_v14 = vpop.xlane.xlu1 %1021  ;;  %3178 = vmatpush1.bf16.msra.mxu0 %v4174_v30  ;;  %3260 = vmatpush1.bf16.msra.mxu1 %v4177_v26  ;;  %v2322_v44 = vrot.slane %v1781_v54, %v4910_v49  ;;  %v2326_v30 = vrot.slane %v1782_v23, %v4913_v50 }
 0x18c   : > { %v1335_v15 = vmul.f32 0.0625, %v1022_v14  ;;  %v1019_v33 = vpop.xlane.xlu0 %1018  ;;  %3179 = vmatprep.subr.bf16.mxu0 %v4182_v42  ;;  %3261 = vmatprep.subr.bf16.mxu1 %v4185_v2  ;;  %v4192_v42 = vld [vmem:[%s4674_s14 + $0x2c0] ss:$16 sps:$4 sm:$0xff]   ;;  %v4195_v2 = vld [vmem:[%s4674_s14 + $0x2c8] ss:$16 sps:$4 sm:$0xff]  }
 0x18d   : > { %v1799_v18 = vunpack.c.l.b16 %v1486_v6  ;;  %v1800_v9 = vunpack.c.h.b16 %v1486_v6  ;;  %v1334_v19 = vmul.f32 0.0625, %v1019_v33  ;;  %v4200_v14 = vld [vmem:[%s4674_s14 + $0x2e4] ss:$16 sps:$4 sm:$0xff]  }
 0x18f   : > { %v2410_v60 = vrot.slane %v1799_v18, %v4924_v0  ;;  %v2415_v4 = vrot.slane %v1800_v9, %v4927_v1  ;;  %v1446_v53 = vpack.c.bf16 %v1335_v15, %v1334_v19  ;;  %v1214_v59 = vpop.xlane.xlu1 %1213  ;;  %3180 = vmatpush1.bf16.msra.mxu0 %v4180_v3  ;;  %3262 = vmatpush1.bf16.msra.mxu1 %v4183_v27  ;;  %v4198_v19 = vld [vmem:[%s4674_s14 + $0x2e0] ss:$16 sps:$4 sm:$0xff]  }
 0x190   : > { %v1399_v36 = vmul.f32 0.0625, %v1214_v59  ;;  %v1211_v10 = vpop.xlane.xlu0 %1210  ;;  %3181 = vmatprep.subr.bf16.mxu0 %v4188_v58  ;;  %3263 = vmatprep.subr.bf16.mxu1 %v4191_v28  ;;  %v2327_v27 = vsel %vm1824_vm1, %v2326_v30, %v2322_v44  ;;  %v4201_v58 = vld [vmem:[%s4674_s14 + $0x2e8] ss:$16 sps:$4 sm:$0xff]   ;;  %v4210_v44 = vld [vmem:[%s4674_s14 + $0x320] ss:$16 sps:$4 sm:$0xff]  }
 0x191   : > { %v2411_v37 = vsel %vm1831_vm2, %v2410_v60, %v2406_v31  ;;  %v1719_v22 = vunpack.c.l.b16 %v1446_v53  ;;  %v1720_v29 = vunpack.c.h.b16 %v1446_v53  ;;  %v1398_v63 = vmul.f32 0.0625, %v1211_v10  ;;  %v4209_v60 = vld [vmem:[%s4674_s14 + $0x30c] ss:$16 sps:$4 sm:$0xff]   ;;  %v4204_v10 = vld [vmem:[%s4674_s14 + $0x300] ss:$16 sps:$4 sm:$0xff]  }
 0x192   : > { %v5387_v38 = vsel %vm1838_vm3, %v2415_v4, %v2411_v37  ;;  %v4213_v30 = vld [vmem:[%s4674_s14 + $0x328] ss:$16 sps:$4 sm:$0xff]  }
 0x193   : > { %v2015_v20 = vrot.slane %v1719_v22, %v4924_v0  ;;  %v2020_v48 = vrot.slane %v1720_v29, %v4927_v1  ;;  %v1478_v5 = vpack.c.bf16 %v1399_v36, %v1398_v63  ;;  %v1076_v61 = vpop.xlane.xlu1 %1075  ;;  %3182 = vmatpush1.bf16.msra.mxu0 %v4186_v16  ;;  %3264 = vmatpush1.bf16.msra.mxu1 %v4189_v21  ;;  %v4207_v16 = vld [vmem:[%s4674_s14 + $0x308] ss:$16 sps:$4 sm:$0xff]   ;;  %v4212_v63 = vld [vmem:[%s4674_s14 + $0x324] ss:$16 sps:$4 sm:$0xff]  }
 0x194   : > { %v1353_v26 = vmul.f32 0.0625, %v1076_v61  ;;  %v1073_v43 = vpop.xlane.xlu0 %1072  ;;  %3183 = vmatprep.subr.bf16.mxu0 %v4194_v17  ;;  %3265 = vmatprep.subr.bf16.mxu1 %v4197_v12  ;;  %v4215_v17 = vld [vmem:[%s4674_s14 + $0x32c] ss:$16 sps:$4 sm:$0xff]  }
 0x195   : > { %v2016_v45 = vsel %vm1831_vm2, %v2015_v20, %v2011_v57  ;;  %v1783_v11 = vunpack.c.l.b16 %v1478_v5  ;;  %v1784_v46 = vunpack.c.h.b16 %v1478_v5  ;;  %v1352_v6 = vmul.f32 0.0625, %v1073_v43 }
 0x196   : > { %v5400_v49 = vsel %vm1838_vm3, %v2020_v48, %v2016_v45  ;;  %v4218_v45 = vld [vmem:[%s4674_s14 + $0x344] ss:$16 sps:$4 sm:$0xff]  }
 0x197   : > { %v2331_v50 = vrot.slane %v1783_v11, %v4924_v0  ;;  %v2336_v15 = vrot.slane %v1784_v46, %v4927_v1  ;;  %v1455_v33 = vpack.c.bf16 %v1353_v26, %v1352_v6  ;;  %v1268_v3 = vpop.xlane.xlu1 %1267  ;;  %3184 = vmatpush1.bf16.msra.mxu0 %v4192_v42  ;;  %3266 = vmatpush1.bf16.msra.mxu1 %v4195_v2  ;;  %v4206_v1 = vld [vmem:[%s4674_s14 + $0x304] ss:$16 sps:$4 sm:$0xff]   ;;  %v4221_v11 = vld [vmem:[%s4674_s14 + $0x34c] ss:$16 sps:$4 sm:$0xff]  }
 0x198   : > { %v1417_v18 = vmul.f32 0.0625, %v1268_v3  ;;  %v1265_v9 = vpop.xlane.xlu0 %1264  ;;  %3185 = vmatprep.subr.bf16.mxu0 %v4200_v14  ;;  %3267 = vmatprep.subr.bf16.mxu1 %v4203_v39 }
 0x199   : > { %v2332_v28 = vsel %vm1831_vm2, %v2331_v50, %v2327_v27  ;;  %v1737_v31 = vunpack.c.l.b16 %v1455_v33  ;;  %v1738_v25 = vunpack.c.h.b16 %v1455_v33  ;;  %v1416_v0 = vmul.f32 0.0625, %v1265_v9  ;;  %v4219_v33 = vld [vmem:[%s4674_s14 + $0x348] ss:$16 sps:$4 sm:$0xff]   ;;  %v4224_v9 = vld [vmem:[%s4674_s14 + $0x364] ss:$16 sps:$4 sm:$0xff]  }
 0x19a   : > { %v5411_v4 = vsel %vm1838_vm3, %v2336_v15, %v2332_v28  ;;  %v4216_v15 = vld [vmem:[%s4674_s14 + $0x340] ss:$16 sps:$4 sm:$0xff]  }
 0x19b   : > { %v2104_v53 = vrot.slane %v1737_v31, %v4991_v32  ;;  %v2109_v59 = vrot.slane %v1738_v25, %v4995_v34  ;;  %v1487_v47 = vpack.c.bf16 %v1417_v18, %v1416_v0  ;;  %v1028_v54 = vpop.xlane.xlu1 %1027  ;;  %3186 = vmatpush1.bf16.msra.mxu0 %v4198_v19  ;;  %3268 = vmatpush1.bf16.msra.mxu1 %v4201_v58  ;;  %v4227_v19 = vld [vmem:[%s4674_s14 + $0x36c] ss:$16 sps:$4 sm:$0xff]  }
 0x19c   : > { %v1337_v23 = vmul.f32 0.0625, %v1028_v54  ;;  %v1025_v36 = vpop.xlane.xlu0 %1024  ;;  %3187 = vmatprep.subr.bf16.mxu0 %v4206_v1  ;;  %3269 = vmatprep.subr.bf16.mxu1 %v4209_v60  ;;  %v4225_v1 = vld [vmem:[%s4674_s14 + $0x368] ss:$16 sps:$4 sm:$0xff]   ;;  %v4228_v54 = vld [vmem:[%s4674_s14 + $0x380] ss:$16 sps:$4 sm:$0xff]  }
 0x19d   : > { %v2105_v21 = vsel %vm1845_vm4, %v2104_v53, %v5362_v40  ;;  %v1801_v37 = vunpack.c.l.b16 %v1487_v47  ;;  %v1802_v22 = vunpack.c.h.b16 %v1487_v47  ;;  %v1336_v29 = vmul.f32 0.0625, %v1025_v36  ;;  %v4230_v53 = vld [vmem:[%s4674_s14 + $0x384] ss:$16 sps:$4 sm:$0xff]   ;;  %v4239_v36 = vld [vmem:[%s4674_s14 + $0x3ac] ss:$16 sps:$4 sm:$0xff]  }
 0x19e   : > { %v5422_v12 = vsel %vm1852_vm5, %v2109_v59, %v2105_v21  ;;  %v4233_v59 = vld [vmem:[%s4674_s14 + $0x38c] ss:$16 sps:$4 sm:$0xff]   ;;  %v4234_v21 = vld [vmem:[%s4674_s14 + $0x3a0] ss:$16 sps:$4 sm:$0xff]  }
 0x19f   : > { %v2420_v20 = vrot.slane %v1801_v37, %v4991_v32  ;;  %v2425_v48 = vrot.slane %v1802_v22, %v4995_v34  ;;  %v1447_v5 = vpack.c.bf16 %v1337_v23, %v1336_v29  ;;  %v1220_v40 = vpop.xlane.xlu1 %1219  ;;  %3188 = vmatpush1.bf16.msra.mxu0 %v4204_v10  ;;  %3270 = vmatpush1.bf16.msra.mxu1 %v4207_v16  ;;  %v4231_v23 = vld [vmem:[%s4674_s14 + $0x388] ss:$16 sps:$4 sm:$0xff]   ;;  %v4242_v22 = vld [vmem:[%s4674_s14 + $0x3c4] ss:$16 sps:$4 sm:$0xff]   ;;  %v4245_v29 = vld [vmem:[%s4674_s14 + $0x3cc] ss:$16 sps:$4 sm:$0xff]  }
 0x1a0   : > { %v1401_v61 = vmul.f32 0.0625, %v1220_v40  ;;  %v1217_v57 = vpop.xlane.xlu0 %1216  ;;  %3189 = vmatprep.subr.bf16.mxu0 %v4212_v63  ;;  %3271 = vmatprep.subr.bf16.mxu1 %v4215_v17  ;;  %v4237_v37 = vld [vmem:[%s4674_s14 + $0x3a8] ss:$16 sps:$4 sm:$0xff]   ;;  %v4251_v40 = vld [vmem:[%s4674_s14 + $0x3ec] ss:$16 sps:$4 sm:$0xff]  }
 0x1a1   : > { %v2421_v26 = vsel %vm1845_vm4, %v2420_v20, %v5387_v38  ;;  %v1721_v43 = vunpack.c.l.b16 %v1447_v5  ;;  %v1722_v42 = vunpack.c.h.b16 %v1447_v5  ;;  %v1400_v2 = vmul.f32 0.0625, %v1217_v57  ;;  %v4240_v20 = vld [vmem:[%s4674_s14 + $0x3c0] ss:$16 sps:$4 sm:$0xff]   ;;  %v4248_v5 = vld [vmem:[%s4674_s14 + $0x3e4] ss:$16 sps:$4 sm:$0xff]  }
 0x1a2   : > { %v5433_v46 = vsel %vm1852_vm5, %v2425_v48, %v2421_v26  ;;  %v4243_v48 = vld [vmem:[%s4674_s14 + $0x3c8] ss:$16 sps:$4 sm:$0xff]  }
 0x1a3   : > { %v2025_v6 = vrot.slane %v1721_v43, %v4991_v32  ;;  %v2030_v14 = vrot.slane %v1722_v42, %v4995_v34  ;;  %v1479_v39 = vpack.c.bf16 %v1401_v61, %v1400_v2  ;;  %v5437_v38 = vpop.xlane.xlu1 %1081  ;;  %3190 = vmatpush1.bf16.msra.mxu0 %v4210_v44  ;;  %3272 = vmatpush1.bf16.msra.mxu1 %v4213_v30  ;;  %v4246_v44 = vld [vmem:[%s4674_s14 + $0x3e0] ss:$16 sps:$4 sm:$0xff]   ;;  %v4249_v30 = vld [vmem:[%s4674_s14 + $0x3e8] ss:$16 sps:$4 sm:$0xff]  }
 0x1a4   : > { %v5439_v50 = vpop.xlane.xlu0 %1078  ;;  %3191 = vmatprep.subr.bf16.mxu0 %v4218_v45  ;;  %3273 = vmatprep.subr.bf16.mxu1 %v4221_v11  ;;  %v1355_v45 = vmul.f32 0.0625, %v5437_v38 }
 0x1a5   : > { %v2026_v3 = vsel %vm1845_vm4, %v2025_v6, %v5400_v49  ;;  %v1785_v27 = vunpack.c.l.b16 %v1479_v39  ;;  %v1786_v18 = vunpack.c.h.b16 %v1479_v39  ;;  %v4222_v49 = vld [vmem:[%s4674_s14 + $0x360] ss:$16 sps:$4 sm:$0xff]   ;;  %v1354_v11 = vmul.f32 0.0625, %v5439_v50 }
 0x1a6   : > { %v5448_v58 = vsel %vm1852_vm5, %v2030_v14, %v2026_v3 }
 0x1a7   : > { %v2341_v28 = vrot.slane %v1785_v27, %v4991_v32  ;;  %v2346_v31 = vrot.slane %v1786_v18, %v4995_v34  ;;  %v1274_v25 = vpop.xlane.xlu1 %1273  ;;  %3192 = vmatpush1.bf16.msra.mxu0 %v4216_v15  ;;  %3274 = vmatpush1.bf16.msra.mxu1 %v4219_v33  ;;  %v1456_v27 = vpack.c.bf16 %v1355_v45, %v1354_v11 }
 0x1a8   : > { %v1271_v0 = vpop.xlane.xlu0 %1270  ;;  %3193 = vmatprep.subr.bf16.mxu0 %v4224_v9  ;;  %3275 = vmatprep.subr.bf16.mxu1 %v4227_v19  ;;  %v1419_v14 = vmul.f32 0.0625, %v1274_v25 }
 0x1a9   : > { %v2342_v60 = vsel %vm1845_vm4, %v2341_v28, %v5411_v4  ;;  %v4236_v4 = vld [vmem:[%s4674_s14 + $0x3a4] ss:$16 sps:$4 sm:$0xff]   ;;  %v1418_v39 = vmul.f32 0.0625, %v1271_v0  ;;  %v1740_v25 = vunpack.c.h.b16 %v1456_v27 }
 0x1aa   : > { %v5459_v32 = vsel %vm1852_vm5, %v2346_v31, %v2342_v60 }
 0x1ab   : > { %v1034_v34 = vpop.xlane.xlu1 %1033  ;;  %3194 = vmatpush1.bf16.msra.mxu0 %v4222_v49  ;;  %3276 = vmatpush1.bf16.msra.mxu1 %v4225_v1  ;;  %v1488_v9 = vpack.c.bf16 %v1419_v14, %v1418_v39 }
 0x1ac   : > { %v1031_v47 = vpop.xlane.xlu0 %1030  ;;  %3195 = vmatprep.subr.bf16.mxu0 %v4230_v53  ;;  %3277 = vmatprep.subr.bf16.mxu1 %v4233_v59  ;;  %v1339_v15 = vmul.f32 0.0625, %v1034_v34  ;;  %v1739_v53 = vunpack.c.l.b16 %v1456_v27 }
 0x1ad   : > { %v1338_v33 = vmul.f32 0.0625, %v1031_v47  ;;  %v1803_v38 = vunpack.c.l.b16 %v1488_v9 }
 0x1af   : > { %v1226_v10 = vpop.xlane.xlu1 %1225  ;;  %3196 = vmatpush1.bf16.msra.mxu0 %v4228_v54  ;;  %3278 = vmatpush1.bf16.msra.mxu1 %v4231_v23  ;;  %v1448_v19 = vpack.c.bf16 %v1339_v15, %v1338_v33 }
 0x1b0   : > { %v1223_v16 = vpop.xlane.xlu0 %1222  ;;  %3197 = vmatprep.subr.bf16.mxu0 %v4236_v4  ;;  %3279 = vmatprep.subr.bf16.mxu1 %v4239_v36  ;;  %v1403_v28 = vmul.f32 0.0625, %v1226_v10  ;;  %v2114_v4 = vrot.slane %v1739_v53, %v5116_v41  ;;  %v1804_v36 = vunpack.c.h.b16 %v1488_v9 }
 0x1b1   : > { %v1402_v31 = vmul.f32 0.0625, %v1223_v16  ;;  %v1723_v54 = vunpack.c.l.b16 %v1448_v19  ;;  %v2430_v16 = vrot.slane %v1803_v38, %v5116_v41 }
 0x1b3   : > { %v1088_v63 = vpop.xlane.xlu1 %1087  ;;  %3198 = vmatpush1.bf16.msra.mxu0 %v4234_v21  ;;  %3280 = vmatpush1.bf16.msra.mxu1 %v4237_v37  ;;  %v1480_v50 = vpack.c.bf16 %v1403_v28, %v1402_v31  ;;  %v2431_v11 = vsel %vm1859_vm6, %v2430_v16, %v5433_v46 }
 0x1b4   : > { %v1085_v17 = vpop.xlane.xlu0 %1084  ;;  %3199 = vmatprep.subr.bf16.mxu0 %v4242_v22  ;;  %3281 = vmatprep.subr.bf16.mxu1 %v4245_v29  ;;  %v1357_v1 = vmul.f32 0.0625, %v1088_v63  ;;  %v1724_v22 = vunpack.c.h.b16 %v1448_v19  ;;  %v2035_v29 = vrot.slane %v1723_v54, %v5116_v41 }
 0x1b5   : > { %v1356_v60 = vmul.f32 0.0625, %v1085_v17  ;;  %v1787_v63 = vunpack.c.l.b16 %v1480_v50 }
 0x1b6   : > { %v2040_v14 = vrot.slane %v1724_v22, %v5123_v51  ;;  %v2036_v39 = vsel %vm1859_vm6, %v2035_v29, %v5448_v58 }
 0x1b7   : > { %v1280_v61 = vpop.xlane.xlu1 %1279  ;;  %3200 = vmatpush1.bf16.msra.mxu0 %v4240_v20  ;;  %3282 = vmatpush1.bf16.msra.mxu1 %v4243_v48  ;;  %v1457_v0 = vpack.c.bf16 %v1357_v1, %v1356_v60 }
 0x1b8   : > { %v1277_v57 = vpop.xlane.xlu0 %1276  ;;  %3201 = vmatprep.subr.bf16.mxu0 %v4248_v5  ;;  %3283 = vmatprep.subr.bf16.mxu1 %v4251_v40  ;;  %v1421_v34 = vmul.f32 0.0625, %v1280_v61  ;;  %v2041_v53 = vsel %vm1866_vm7, %v2040_v14, %v2036_v39 }
 0x1b9   : > { %v1420_v47 = vmul.f32 0.0625, %v1277_v57  ;;  %v1741_v61 = vunpack.c.l.b16 %v1457_v0  ;;  %v1742_v15 = vunpack.c.h.b16 %v1457_v0 }
 0x1bb   : > { %v1040_v26 = vpop.xlane.xlu1 %1039  ;;  %3202 = vmatpush1.bf16.msra.mxu0 %v4246_v44  ;;  %3284 = vmatpush1.bf16.msra.mxu1 %v4249_v30  ;;  %v1489_v57 = vpack.c.bf16 %v1421_v34, %v1420_v47  ;;  %v2115_v44 = vsel %vm1859_vm6, %v2114_v4, %v5422_v12  ;;  %v2119_v30 = vrot.slane %v1740_v25, %v5123_v51 }
 0x1bc   : > { %v1037_v43 = vpop.xlane.xlu0 %1036  ;;  %v1341_v21 = vmul.f32 0.0625, %v1040_v26  ;;  %v2435_v26 = vrot.slane %v1804_v36, %v5123_v51 }
 0x1bd   : > { %v1340_v37 = vmul.f32 0.0625, %v1037_v43  ;;  %v1805_v27 = vunpack.c.l.b16 %v1489_v57  ;;  %v2120_v28 = vsel %vm1866_vm7, %v2119_v30, %v2115_v44 }
 0x1bf   : > { %v1232_v42 = vpop.xlane.xlu1 %1231  ;;  %v1449_v43 = vpack.c.bf16 %v1341_v21, %v1340_v37 }
 0x1c0   : > { %v1229_v2 = vpop.xlane.xlu0 %1228  ;;  %v1405_v20 = vmul.f32 0.0625, %v1232_v42  ;;  %v1788_v42 = vunpack.c.h.b16 %v1480_v50  ;;  %v2129_v50 = vrot.slane %v1742_v15, %v5137_v62 }
 0x1c1   : > { %v1404_v48 = vmul.f32 0.0625, %v1229_v2  ;;  %v2351_v2 = vrot.slane %v1787_v63, %v5116_v41  ;;  %v1725_v46 = vunpack.c.l.b16 %v1449_v43  ;;  %v2436_v41 = vsel %vm1866_vm7, %v2435_v26, %v2431_v11 }
 0x1c2   : > { %v2356_v38 = vrot.slane %v1788_v42, %v5123_v51 }
 0x1c3   : > { %v1094_v6 = vpop.xlane.xlu1 %1093  ;;  %v1481_v12 = vpack.c.bf16 %v1405_v20, %v1404_v48  ;;  %v2352_v58 = vsel %vm1859_vm6, %v2351_v2, %v5459_v32  ;;  %v2045_v47 = vrot.slane %v1725_v46, %v5126_v52 }
 0x1c4   : > { %v1091_v3 = vpop.xlane.xlu0 %1090  ;;  %v1359_v5 = vmul.f32 0.0625, %v1094_v6  ;;  %v2357_v63 = vsel %vm1866_vm7, %v2356_v38, %v2352_v58 }
 0x1c5   : > { %v1358_v40 = vmul.f32 0.0625, %v1091_v3  ;;  %v2124_v3 = vrot.slane %v1741_v61, %v5126_v52  ;;  %v1790_v37 = vunpack.c.h.b16 %v1481_v12  ;;  %v2046_v14 = vsel %vm1873_vm8, %v2045_v47, %v2041_v53 }
 0x1c7   : > { %v1286_v18 = vpop.xlane.xlu1 %1285  ;;  %v1458_v33 = vpack.c.bf16 %v1359_v5, %v1358_v40  ;;  %v2125_v0 = vsel %vm1873_vm8, %v2124_v3, %v2120_v28  ;;  %v2366_v42 = vrot.slane %v1790_v37, %v5137_v62 }
 0x1c8   : > { %v1283_v49 = vpop.xlane.xlu0 %1282  ;;  %v1423_v9 = vmul.f32 0.0625, %v1286_v18  ;;  %v1806_v18 = vunpack.c.h.b16 %v1489_v57  ;;  %v2130_v40 = vsel %vm1880_vm9, %v2129_v50, %v2125_v0 }
 0x1c9   : > { %v1422_v19 = vmul.f32 0.0625, %v1283_v49  ;;  %v1789_v49 = vunpack.c.l.b16 %v1481_v12  ;;  %v1743_v25 = vunpack.c.l.b16 %v1458_v33  ;;  %v1744_v51 = vunpack.c.h.b16 %v1458_v33 }
 0x1ca   : > { %v2445_v20 = vrot.slane %v1806_v18, %v5137_v62 }
 0x1cb   : > { %v1046_v59 = vpop.xlane.xlu1 %1045  ;;  %v1490_v34 = vpack.c.bf16 %v1423_v9, %v1422_v19  ;;  %v2361_v48 = vrot.slane %v1789_v49, %v5126_v52  ;;  %v2134_v5 = vrot.slane %v1743_v25, %v5143_v7 }
 0x1cc   : > { %v1043_v23 = vpop.xlane.xlu0 %1042  ;;  %v1343_v31 = vmul.f32 0.0625, %v1046_v59  ;;  %v2440_v59 = vrot.slane %v1805_v27, %v5126_v52  ;;  %v2139_v52 = vrot.slane %v1744_v51, %v5146_v8 }
 0x1cd   : > { %v1342_v1 = vmul.f32 0.0625, %v1043_v23  ;;  %v1726_v23 = vunpack.c.h.b16 %v1449_v43  ;;  %v1807_v44 = vunpack.c.l.b16 %v1490_v34  ;;  %v2362_v15 = vsel %vm1873_vm8, %v2361_v48, %v2357_v63 }
 0x1ce   : > { %v2441_v61 = vsel %vm1873_vm8, %v2440_v59, %v2436_v41  ;;  %v2135_v12 = vsel %vm1887_vm10, %v2134_v5, %v2130_v40  ;;  %v1808_v33 = vunpack.c.h.b16 %v1490_v34 }
 0x1cf   : > { %v5478_v10 = vpop.xlane.xlu1 %1237  ;;  %v1450_v4 = vpack.c.bf16 %v1343_v31, %v1342_v1  ;;  %v2050_v57 = vrot.slane %v1726_v23, %v5137_v62  ;;  %v2446_v39 = vsel %vm1880_vm9, %v2445_v20, %v2441_v61  ;;  %v2367_v31 = vsel %vm1880_vm9, %v2366_v42, %v2362_v15 }
 0x1d0   : > { %v1235_v17 = vpop.xlane.xlu0 %1234  ;;  %v1407_v26 = vmul.f32 0.0625, %v5478_v10  ;;  %v2450_v10 = vrot.slane %v1807_v44, %v5143_v7  ;;  %v2140_v1 = vsel %vm1894_vm11, %v2139_v52, %v2135_v12  ;;  %v2455_v58 = vrot.slane %v1808_v33, %v5146_v8 }
 0x1d1   : > { %v1727_v30 = vunpack.c.l.b16 %v1450_v4  ;;  %v1406_v43 = vmul.f32 0.0625, %v1235_v17  ;;  %v1728_v17 = vunpack.c.h.b16 %v1450_v4  ;;  %v2051_v9 = vsel %vm1880_vm9, %v2050_v57, %v2046_v14 }
 0x1d2   : > { %v2451_v18 = vsel %vm1887_vm10, %v2450_v10, %v2446_v39 }
 0x1d3   : > { %v1100_v45 = vpop.xlane.xlu1 %1099  ;;  %v2055_v62 = vrot.slane %v1727_v30, %v5143_v7  ;;  %v1482_v19 = vpack.c.bf16 %v1407_v26, %v1406_v43  ;;  %v2060_v49 = vrot.slane %v1728_v17, %v5146_v8 }
 0x1d4   : > { %v1097_v6 = vpop.xlane.xlu0 %1096  ;;  %v1361_v36 = vmul.f32 0.0625, %v1100_v45 }
 0x1d5   : > { %v1360_v21 = vmul.f32 0.0625, %v1097_v6  ;;  %v2056_v59 = vsel %vm1887_vm10, %v2055_v62, %v2051_v9  ;;  %v1791_v23 = vunpack.c.l.b16 %v1482_v19 }
 0x1d6   : > { %v2061_v20 = vsel %vm1894_vm11, %v2060_v49, %v2056_v59 }
 0x1d7   : > { %v1292_v60 = vpop.xlane.xlu1 %1291  ;;  %v1459_v45 = vpack.c.bf16 %v1361_v36, %v1360_v21  ;;  %v1792_v36 = vunpack.c.h.b16 %v1482_v19  ;;  %v2371_v61 = vrot.slane %v1791_v23, %v5143_v7 }
 0x1d8   : > { %v1289_v54 = vpop.xlane.xlu0 %1288  ;;  %v1425_v16 = vmul.f32 0.0625, %v1292_v60 }
 0x1d9   : > { %v1424_v22 = vmul.f32 0.0625, %v1289_v54  ;;  %v1745_v28 = vunpack.c.l.b16 %v1459_v45  ;;  %v1746_v25 = vunpack.c.h.b16 %v1459_v45  ;;  %v2376_v43 = vrot.slane %v1792_v36, %v5146_v8 }
 0x1da   : > { %v2372_v9 = vsel %vm1887_vm10, %v2371_v61, %v2367_v31 }
 0x1db   : > { %v1052_v32 = vpop.xlane.xlu1 %1051  ;;  %v1491_v2 = vpack.c.bf16 %v1425_v16, %v1424_v22  ;;  %v2144_v34 = vrot.slane %v1745_v28, %v5179_v55  ;;  %v2456_v16 = vsel %vm1894_vm11, %v2455_v58, %v2451_v18  ;;  %v2149_v48 = vrot.slane %v1746_v25, %v5182_v56 }
 0x1dc   : > { %v1049_v29 = vpop.xlane.xlu0 %1048  ;;  %v1345_v3 = vmul.f32 0.0625, %v1052_v32 }
 0x1dd   : > { %v1344_v27 = vmul.f32 0.0625, %v1049_v29  ;;  %v1809_v60 = vunpack.c.l.b16 %v1491_v2  ;;  %v1810_v21 = vunpack.c.h.b16 %v1491_v2  ;;  %v2145_v57 = vsel %vm1901_vm12, %v2144_v34, %v2140_v1 }
 0x1de   : > { %v2150_v33 = vsel %vm1908_vm13, %v2149_v48, %v2145_v57 }
 0x1df   : > { %v1244_v11 = vpop.xlane.xlu1 %1243  ;;  %v1451_v0 = vpack.c.bf16 %v1345_v3, %v1344_v27  ;;  %v2460_v32 = vrot.slane %v1809_v60, %v5179_v55 }
 0x1e0   : > { %v1241_v6 = vpop.xlane.xlu0 %1240  ;;  %v1409_v38 = vmul.f32 0.0625, %v1244_v11  ;;  %v2465_v11 = vrot.slane %v1810_v21, %v5182_v56 }
 0x1e1   : > { %v1408_v54 = vmul.f32 0.0625, %v1241_v6  ;;  %v1729_v5 = vunpack.c.l.b16 %v1451_v0  ;;  %v2461_v45 = vsel %vm1901_vm12, %v2460_v32, %v2456_v16  ;;  %v1730_v15 = vunpack.c.h.b16 %v1451_v0 }
 0x1e3   : > { %v1106_v46 = vpop.xlane.xlu1 %1105  ;;  %v1483_v22 = vpack.c.bf16 %v1409_v38, %v1408_v54  ;;  %v2065_v7 = vrot.slane %v1729_v5, %v5179_v55  ;;  %v2070_v58 = vrot.slane %v1730_v15, %v5182_v56  ;;  %v4253_v15 = vld [vmem:[%s5718_s3 + $0xc0] sm:$0xff] (!%p3935_p10)  }
 0x1e4   : > { %v1363_v41 = vmul.f32 0.0625, %v1106_v46  ;;  %v1103_v53 = vpop.xlane.xlu0 %1102  ;;  %v2466_v46 = vsel %vm1908_vm13, %v2465_v11, %v2461_v45  ;;  %3997 = vmatprep.subr.bf16.mxu1 (!%p3935_p10), %v4253_v15 }
 0x1e5   : > { %v1362_v50 = vmul.f32 0.0625, %v1103_v53  ;;  %v1793_v52 = vunpack.c.l.b16 %v1483_v22  ;;  %v1794_v62 = vunpack.c.h.b16 %v1483_v22  ;;  %v2066_v31 = vsel %vm1901_vm12, %v2065_v7, %v2061_v20  ;;  %v4254_v7 = vld [vmem:[%s5718_s3] sm:$0xff] (!%p3935_p10)  }
 0x1e6   : > { %v4339_v20 = vmov 1983009808  }
 0x1e7   : > { %v1460_v47 = vpack.c.bf16 %v1363_v41, %v1362_v50  ;;  %v1298_v4 = vpop.xlane.xlu1 %1297  ;;  %v2381_v1 = vrot.slane %v1793_v52, %v5179_v55  ;;  %v2377_v55 = vsel %vm1894_vm11, %v2376_v43, %v2372_v9  ;;  %v2386_v0 = vrot.slane %v1794_v62, %v5182_v56  ;;  %v1428_v52 = vld [vmem:[#allocation2] sm:$0xff]  ;;  %v4262_v9 = vld [vmem:[%s5718_s3 + $0x10] sm:$0xff] (!%p3935_p10)  }
 0x1e8   : > { %v1427_v37 = vmul.f32 0.0625, %v1298_v4  ;;  %v1295_v51 = vpop.xlane.xlu0 %1294  ;;  %v2071_v4 = vsel %vm1908_vm13, %v2070_v58, %v2066_v31  ;;  %v3301_v48 = vunpack.c.l.s4 %v4339_v20  ;;  %v4263_v62 = vld [vmem:[%s5718_s3 + $0x90] sm:$0xff] (!%p3935_p10)   ;;  %v4271_v58 = vld [vmem:[%s5718_s3 + $0xa0] sm:$0xff] (!%p3935_p10)   ;;  %v4275_v31 = vld [vmem:[%s5718_s3 + $0xa8] sm:$0xff] (!%p3935_p10)  }
 0x1e9   : > { %v1747_v29 = vunpack.c.l.b16 %v1460_v47  ;;  %v1426_v63 = vmul.f32 0.0625, %v1295_v51  ;;  %v1748_v40 = vunpack.c.h.b16 %v1460_v47  ;;  %v2382_v23 = vsel %vm1901_vm12, %v2381_v1, %v2377_v55  ;;  %v4267_v1 = vld [vmem:[%s5718_s3 + $0x98] sm:$0xff] (!%p3935_p10)  }
 0x1ea   : > { %v2387_v51 = vsel %vm1908_vm13, %v2386_v0, %v2382_v23  ;;  %v3302_v5 = vunpack.c.0.s8 %v3301_v48  ;;  %v3327_v55 = vsub.s32 (!%p3935_p10), 0, %v4897_v35  ;;  %v4279_v0 = vld [vmem:[%s5718_s3 + $0xb0] sm:$0xff] (!%p3935_p10)   ;;  %v4280_v23 = vld [vmem:[%s5718_s3 + $0x78] sm:$0xff] (!%p3935_p10)  }
 0x1eb   : > { %v2154_v44 = vrot.slane %v1747_v29, %v5225_v13  ;;  %v1492_v30 = vpack.c.bf16 %v1427_v37, %v1426_v63  ;;  %v1058_v26 = vpop.xlane.xlu1 %1057  ;;  %v2159_v12 = vrot.slane %v1748_v40, %v5228_v24 }
 0x1ec   : > { %v1347_v14 = vmul.f32 0.0625, %v1058_v26  ;;  %v1055_v42 = vpop.xlane.xlu0 %1054 }
 0x1ed   : > { %v1811_v2 = vunpack.c.l.b16 %v1492_v30  ;;  %v1812_v6 = vunpack.c.h.b16 %v1492_v30  ;;  %v1346_v39 = vmul.f32 0.0625, %v1055_v42  ;;  %v2155_v27 = vsel %vm1915_vm14, %v2154_v44, %v2150_v33  ;;  %v4256_v33 = vld [vmem:[%s5718_s3 + $0x48] sm:$0xff] (!%p3935_p10)  }
 0x1ee   : > { %v2160_v54 = vsel %vm1922_vm15, %v2159_v12, %v2155_v27  ;;  %v4255_v12 = vld [vmem:[%s5718_s3 + $0x80] sm:$0xff] (!%p3935_p10)   ;;  %v4261_v27 = vld [vmem:[%s5718_s3 + $0xd0] sm:$0xff] (!%p3935_p10)  }
 0x1ef   : > { %v2470_v10 = vrot.slane %v1811_v2, %v5225_v13  ;;  %v2475_v8 = vrot.slane %v1812_v6, %v5228_v24  ;;  %v1452_v17 = vpack.c.bf16 %v1347_v14, %v1346_v39  ;;  %v1250_v3 = vpop.xlane.xlu1 %1249  ;;  %v4252_v39 = vld [vmem:[%s5718_s3 + $0x40] sm:$0xff] (!%p3935_p10)  }
 0x1f0   : > { %v1411_v19 = vmul.f32 0.0625, %v1250_v3  ;;  %v1247_v28 = vpop.xlane.xlu0 %1246  ;;  %3975 = vmatprep.subr.bf16.mxu0 (!%p3935_p10), %v4252_v39  ;;  %v4260_v3 = vld [vmem:[%s5718_s3 + $0x50] sm:$0xff] (!%p3935_p10)  }
 0x1f1   : > { %v1731_v60 = vunpack.c.l.b16 %v1452_v17  ;;  %v1410_v41 = vmul.f32 0.0625, %v1247_v28  ;;  %v2471_v53 = vsel %vm1915_vm14, %v2470_v10, %v2466_v46  ;;  %v1732_v38 = vunpack.c.h.b16 %v1452_v17  ;;  %v4257_v10 = vld [vmem:[%s5718_s3 + $0xc8] sm:$0xff] (!%p3935_p10)   ;;  %v4265_v28 = vld [vmem:[%s5718_s3 + $0xd8] sm:$0xff] (!%p3935_p10)  }
 0x1f2   : > { %v2476_v50 = vsel %vm1922_vm15, %v2475_v8, %v2471_v53  ;;  %v4258_v8 = vld [vmem:[%s5718_s3 + $0x8] sm:$0xff] (!%p3935_p10)   ;;  %v4266_v46 = vld [vmem:[%s5718_s3 + $0x18] sm:$0xff] (!%p3935_p10)   ;;  %v4270_v53 = vld [vmem:[%s5718_s3 + $0x20] sm:$0xff] (!%p3935_p10)  }
 0x1f3   : > { %v2075_v18 = vrot.slane %v1731_v60, %v5225_v13  ;;  %v1484_v49 = vpack.c.bf16 %v1411_v19, %v1410_v41  ;;  %v2481_v25 = vsel %vm2477_vm0, %v2476_v50, %v2160_v54  ;;  %v2080_v36 = vrot.slane %v1732_v38, %v5228_v24  ;;  %v4259_v17 = vld [vmem:[%s5718_s3 + $0x88] sm:$0xff] (!%p3935_p10)   ;;  %v4264_v19 = vld [vmem:[%s5718_s3 + $0x58] sm:$0xff] (!%p3935_p10)   ;;  %v4268_v60 = vld [vmem:[%s5718_s3 + $0x60] sm:$0xff] (!%p3935_p10)  }
 0x1f4   : > { %v2485_v59 = vpack.c.b16 %v2481_v25, %v2481_v25  ;;  %v4269_v41 = vld [vmem:[%s5718_s3 + $0xe0] sm:$0xff] (!%p3935_p10)   ;;  %v4272_v38 = vld [vmem:[%s5718_s3 + $0x68] sm:$0xff] (!%p3935_p10)   ;;  %v4278_v25 = vld [vmem:[%s5718_s3 + $0x30] sm:$0xff] (!%p3935_p10)  }
 0x1f5   : > { %v1795_v34 = vunpack.c.l.b16 %v1484_v49  ;;  %v1796_v47 = vunpack.c.h.b16 %v1484_v49  ;;  %v2076_v21 = vsel %vm1915_vm14, %v2075_v18, %v2071_v4  ;;  %v4273_v54 = vld [vmem:[%s5718_s3 + $0xe8] sm:$0xff] (!%p3935_p10)   ;;  %v4276_v18 = vld [vmem:[%s5718_s3 + $0x70] sm:$0xff] (!%p3935_p10)   ;;  %v3339_v4 = vsub.s32 (!%p3935_p10), 3, %v4897_v35 }
 0x1f6   : > { %3203 = vmatprep.mubr.bf16.mxu0 %v2485_v59  ;;  %3285 = vmatprep.mubr.bf16.mxu1 %v2485_v59  ;;  %v2081_v16 = vsel %vm1922_vm15, %v2080_v36, %v2076_v21  ;;  %v4274_v50 = vld [vmem:[%s5718_s3 + $0x28] sm:$0xff] (!%p3935_p10)   ;;  %v4277_v49 = vld [vmem:[%s5718_s3 + $0xf0] sm:$0xff] (!%p3935_p10)   ;;  %v3331_v59 = vsub.s32 (!%p3935_p10), 1, %v4897_v35  ;;  %v4282_v36 = vld [vmem:[%s5718_s3 + $0x38] sm:$0xff] (!%p3935_p10)  }
 0x1f7   : > { %v2391_v32 = vrot.slane %v1795_v34, %v5225_v13  ;;  %v2396_v37 = vrot.slane %v1796_v47, %v5228_v24  ;;  %v5567_v24 = vsub.s32 %v3302_v5, %v4897_v35  ;;  %v3335_v34 = vsub.s32 (!%p3935_p10), 2, %v4897_v35  ;;  %v4281_v47 = vld [vmem:[%s5718_s3 + $0xf8] sm:$0xff] (!%p3935_p10)  }
 0x1f8   : > { %v4283_v21 = vld [vmem:[%s5718_s3 + $0xb8] sm:$0xff] (!%p3935_p10)  }
 0x1f9   : > { %v2392_v56 = vsel %vm1915_vm14, %v2391_v32, %v2387_v51  ;;  %v3323_v32 = vld [vmem:[%s5717_s2] sm:$0xf] (!%p3935_p10) }
 0x1fa   : > { %v2397_v22 = vsel %vm1922_vm15, %v2396_v37, %v2392_v56  ;;  %v3328_v37 = vrot.slane (!%p3935_p10), %v3323_v32, %v3327_v55  ;;  %v3332_v51 = vrot.slane (!%p3935_p10), %v3323_v32, %v3331_v59  ;;  %v3336_v56 = vrot.slane (!%p3935_p10), %v3323_v32, %v3335_v34 }
 0x1fb   : > { %v2480_v29 = vsel %vm2477_vm0, %v2397_v22, %v2081_v16  ;;  %v3340_v35 = vrot.slane (!%p3935_p10), %v3323_v32, %v3339_v4 }
 0x1fc   : > { %v2484_v63 = vpack.c.b16 %v2480_v29, %v2480_v29  ;;  %v3341_v16 = vcombine.low (!%p3935_p10), %v3328_v37, %v3332_v51 }
 0x1fd   : > { %v3342_v22 = vcombine.low (!%p3935_p10), %v3336_v56, %v3340_v35 }
 0x1fe   : > { %3204 = vmatmul.mubr.bf16.vlgmr.msra.gmra.mrb[0].mxu0 %v2484_v63  ;;  %3286 = vmatmul.mubr.bf16.vlgmr.msra.gmra.mrb[0].mxu1 %v2484_v63  ;;  %v3349_v29 = vrot.slane (!%p3935_p10), %v3341_v16, %v5567_v24 }
 0x1ff   : > { %3976 = vmatpush3.bf16.msra.mxu0 (!%p3935_p10), %v4254_v7  ;;  %3998 = vmatpush3.bf16.msra.mxu1 (!%p3935_p10), %v4255_v12  ;;  %v3356_v63 = vrot.slane (!%p3935_p10), %v3342_v22, %v5567_v24 }
 0x200   : > { %3977 = vmatprep.subr.bf16.mxu0 (!%p3935_p10), %v4256_v33  ;;  %3999 = vmatprep.subr.bf16.mxu1 (!%p3935_p10), %v4257_v10 }
 0x201   : > { %v3357_v48 = vcombine.low (!%p3935_p10), %v3349_v29, %v3356_v63 }
 0x203   : > { %3978 = vmatpush3.bf16.msra.mxu0 (!%p3935_p10), %v4258_v8  ;;  %4000 = vmatpush3.bf16.msra.mxu1 (!%p3935_p10), %v4259_v17 }
 0x204   : > { %3979 = vmatprep.subr.bf16.mxu0 (!%p3935_p10), %v4260_v3  ;;  %4001 = vmatprep.subr.bf16.mxu1 (!%p3935_p10), %v4261_v27 }
 0x207   : > { %3980 = vmatpush3.bf16.msra.mxu0 (!%p3935_p10), %v4262_v9  ;;  %4002 = vmatpush3.bf16.msra.mxu1 (!%p3935_p10), %v4263_v62 }
 0x208   : > { %3981 = vmatprep.subr.bf16.mxu0 (!%p3935_p10), %v4264_v19  ;;  %4003 = vmatprep.subr.bf16.mxu1 (!%p3935_p10), %v4265_v28 }
 0x20b   : > { %3982 = vmatpush3.bf16.msra.mxu0 (!%p3935_p10), %v4266_v46  ;;  %4004 = vmatpush3.bf16.msra.mxu1 (!%p3935_p10), %v4267_v1 }
 0x20c   : > { %3983 = vmatprep.subr.bf16.mxu0 (!%p3935_p10), %v4268_v60  ;;  %4005 = vmatprep.subr.bf16.mxu1 (!%p3935_p10), %v4269_v41 }
 0x20f   : > { %3984 = vmatpush3.bf16.msra.mxu0 (!%p3935_p10), %v4270_v53  ;;  %4006 = vmatpush3.bf16.msra.mxu1 (!%p3935_p10), %v4271_v58 }
 0x210   : > { %3985 = vmatprep.subr.bf16.mxu0 (!%p3935_p10), %v4272_v38  ;;  %4007 = vmatprep.subr.bf16.mxu1 (!%p3935_p10), %v4273_v54 }
 0x213   : > { %3986 = vmatpush3.bf16.msra.mxu0 (!%p3935_p10), %v4274_v50  ;;  %4008 = vmatpush3.bf16.msra.mxu1 (!%p3935_p10), %v4275_v31 }
 0x214   : > { %3987 = vmatprep.subr.bf16.mxu0 (!%p3935_p10), %v4276_v18  ;;  %4009 = vmatprep.subr.bf16.mxu1 (!%p3935_p10), %v4277_v49 }
 0x217   : > { %3988 = vmatpush3.bf16.msra.mxu0 (!%p3935_p10), %v4278_v25  ;;  %4010 = vmatpush3.bf16.msra.mxu1 (!%p3935_p10), %v4279_v0 }
 0x218   : > { %3989 = vmatprep.subr.bf16.mxu0 (!%p3935_p10), %v4280_v23  ;;  %4011 = vmatprep.subr.bf16.mxu1 (!%p3935_p10), %v4281_v47 }
 0x21b   : > { %3990 = vmatpush3.bf16.msra.mxu0 (!%p3935_p10), %v4282_v36  ;;  %4012 = vmatpush3.bf16.msra.mxu1 (!%p3935_p10), %v4283_v21 }
 0x2d1   : > { %v3205_v40 = vpop.f32.mrb[0].mxu0  ;;  %v3287_v13 = vpop.f32.mrb[0].mxu1 }
 0x2d2   : > { %v3207_v61 = vpop.f32.mrb[1].mxu0  ;;  %v3289_v57 = vpop.f32.mrb[1].mxu1 }
 0x2d3   : > { %v3298_v44 = vcombine.low %v3205_v40, %v3207_v61  ;;  %v3299_v30 = vcombine.low %v3287_v13, %v3289_v57  ;;  %v3209_v26 = vpop.f32.mrb[2].mxu0  ;;  %v3291_v43 = vpop.f32.mrb[2].mxu1 }
 0x2d4   : > { %v3210_v45 = vpop.f32.mrb[3].mxu0  ;;  %v3292_v11 = vpop.f32.mrb[3].mxu1 }
 0x2d5   : > { %v3306_v14 = vrot.slane %v3298_v44, %v5567_v24  ;;  %v3313_v42 = vrot.slane %v3299_v30, %v5567_v24  ;;  %3321 = sbr.rel (%p3935_p10) target bundleno = 970 (0x3ca), region = 86 }
 0x2d7   : > { %v3314_v2 = vcombine.low %v3306_v14, %v3313_v42  ;;  %v3936_v42 = vld [vmem:[%s5719_s4] ss:$0 sm:$0xff] (!%p3935_p10) }
 0x2d9   : > { %v3316_v6 = vadd.f32 %v3314_v2, %v1428_v52 }
 0x2db   : > { %3317 = vst [vmem:[#allocation2] sm:$0xff] %v3316_v6 }
 0x2e2   : > { %v3322_v20 = vld [vmem:[#allocation2] sm:$0xff] }
 0x2e3   : > { %v3359_v5 = vadd.f32 %v3357_v48, %v3322_v20 }
 0x2e5   : > { %v3360_v40 = vmax.f32 %v3359_v5, 0.0 }
 0x2e7   : > { %v3369_v13 = vrot.slane %v3360_v40, %v5567_v24  ;;  %v3362_v61 = vcombine.high %v3360_v40, %v3360_v40 }
 0x2e9   : > { %v3377_v57 = vcombine.high %v3369_v13, %v3369_v13  ;;  %v3376_v44 = vrot.slane %v3362_v61, %v5567_v24  ;;  %v3383_v30 = vpack.c.bf16 %v3369_v13, %v3369_v13 }
 0x2eb   : > { %v3384_v26 = vpack.c.bf16 %v3377_v57, %v3377_v57  ;;  %v3378_v43 = vcombine.high %v3376_v44, %v3376_v44  ;;  %v3385_v45 = vpack.c.bf16 %v3376_v44, %v3376_v44 }
 0x2ed   : > { %3682 = vmatprep.mubr.bf16.mxu0 %v3384_v26  ;;  %v3386_v11 = vpack.c.bf16 %v3378_v43, %v3378_v43 }
 0x2ee   : > { %3683 = vmatmul.mubr.bf16.vlgmr.msra.gmra.mrb[0].mxu0 %v3383_v30 }
 0x2ef   : > { %3722 = vmatprep.mubr.bf16.mxu1 %v3386_v11 }
 0x2f0   : > { %3723 = vmatmul.mubr.bf16.vlgmr.msra.gmra.mrb[0].mxu1 %v3385_v45 }
 0x3c1   : > { %v3991_v14 = vpop.f32.mrb[0].mxu0 }
 0x3c2   : > { %v3992_v52 = vpop.f32.mrb[1].mxu0 }
 0x3c3   : > { %v4013_v2 = vpop.f32.mrb[0].mxu1  ;;  %v3993_v6 = vadd.f32 %v3992_v52, %v3991_v14  ;;  %v3994_v39 = vpop.f32.mrb[2].mxu0 }
 0x3c4   : > { %v4014_v15 = vpop.f32.mrb[1].mxu1  ;;  %v3995_v24 = vpop.f32.mrb[3].mxu0 }
 0x3c5   : > { %v3685_v7 = vadd.f32 %v3993_v6, %v3936_v42  ;;  %v4015_v12 = vadd.f32 %v4014_v15, %v4013_v2  ;;  %v4016_v33 = vpop.f32.mrb[2].mxu1 }
 0x3c6   : > { %v4017_v10 = vpop.f32.mrb[3].mxu1 }
 0x3c7   : > { %v3725_v8 = vadd.f32 %v4015_v12, %v3685_v7 }
 0x3c9   : > { %3730 = vst [vmem:[#allocation4] sm:$0x3] %v3725_v8 }
 0x3ca PF: > { %p4031_p11 = scmp.eq.s32.totalorder %s4387_s21, 3  ;;  %s4340_s24 = smov [#allocation4]  }
 0x3cb   : > { %s3738_s26 = sshll.u32 %s4340_s24, 4  ;;  %s3739_s26 = int_to_ptr.vmem [resolvable:$true] %s3738_s26 }
 0x3cc   : > { %s4284_s27 = scalar_lea.vmem %s3739_s26, 32  ;;  %p4291_p1 = scmp.lt.s32.totalorder %s3739_s26, %s3739_s26 }
 0x3cd   : > { %p4285_p12 = scmp.ne.s32.totalorder %s3739_s26, %s4284_s27  ;;  %p4292_p2 = scmp.lt.s32.totalorder %s4284_s27, %s4284_s27 }
 0x3cf   : > { %p4286_p13 = pnand %p4285_p12, %p4031_p11  ;;  %p4293_p3 = por %p4292_p2, %p4291_p1 }
 0x3d1   : > { %p4287_p0 = pneg %p4286_p13 }
 0x3d3   : > { %p4294_p4 = pnand %p4293_p3, %p4287_p0 }
 0x3d5   : > { %4297 = shalt.err (!%p4294_p4)
}
 0x3d6   : > { %s4298_s30 = scalar_lea.hbm %s5720_s5, 32 }
 0x3d7   : > { %p4299_p5 = scmp.ne.s32.totalorder %s5720_s5, %s4298_s30  ;;  %p4304_p8 = scmp.lt.u32.totalorder %s4298_s30, %s5720_s5 }
 0x3d9   : > { %p4300_p6 = pnand %p4299_p5, %p4031_p11 }
 0x3db   : > { %p4301_p7 = pneg %p4300_p6 }
 0x3dd   : > { %p4306_p9 = pnand %p4304_p8, %p4301_p7 }
 0x3df   : > { %4309 = shalt.err (!%p4306_p9)
}
 0x3e0   : > { %4028 = dma.vmem_to_hbm [thread:$0]  (%p4031_p11), %s3739_s26, 32, %s5720_s5, [#allocation5]  }
 0x3e1   : > { %4323 = dma.done.wait (%p4031_p11), [#allocation5], 32  }
 0x3e2   : > { %4325 = vsyncadd (%p4031_p11), [#allocation5], 4294967264 }
 0x3e3 PF: > { %p13_p10 = scmp.ge.s32.totalorder %s4390_s22, 6   ;;  %s5721_s18 = smov %s4332_s19 }
 0x3e4   : > { %s5722_s19 = smov %s4399_s25  ;;  %s5723_s20 = smov %s4390_s22 }
 0x3e5   :  { %15 = sbr.rel (!%p13_p10) target bundleno = 2 (0x2), region = 121 }
 0x3ec   :  { %3751 = vsyncpa [#allocation5], 1 }
 0x3ed   :  { %3753 = vsyncpa [#allocation5 + $0x1], 1 }

</bundles_post_ra>
